<compile_context>
chip_gen: v7x
topology: tpu7x:2x2x1
jax: 0.10.0
libtpu: 0.0.40
codegen_flags: <defaults>
</compile_context>

<pallas_src>
import functools

import jax
import jax.numpy as jnp
from jax import lax
from jax.experimental import pallas as pl
from jax.experimental.pallas import tpu as pltpu

# Scoped-VMEM headroom: below v7x's 64 MiB physical, above the 16/32 MiB
# scoped defaults, so realistic tiles are not rejected.
_VMEM_LIMIT_BYTES = 48 * 1024 * 1024

# y = x @ W^T for PyTorch-layout W (out, in): contract x dim 1 with W dim 1.
_PROJ_DIMS = (((1,), (1,)), ((), ()))


# ---------------------------------------------------------------------------
# Kernel 1: fused Q/K/V projections.
# ---------------------------------------------------------------------------
def _qkv_proj_kernel(q_ref, k_ref, v_ref, wq_ref, wk_ref, wv_ref,
                     qp_ref, kp_ref, vp_ref):
    # Blocks: x -> (ts, hs); W -> (hs, hs); out -> (ts, hs)  (lane-dense).
    # No upcast of inputs/weights; MXU accumulates in f32.
    qp_ref[...] = lax.dot_general(
        q_ref[...], wq_ref[...], _PROJ_DIMS,
        preferred_element_type=jnp.float32).astype(qp_ref.dtype)
    kp_ref[...] = lax.dot_general(
        k_ref[...], wk_ref[...], _PROJ_DIMS,
        preferred_element_type=jnp.float32).astype(kp_ref.dtype)
    vp_ref[...] = lax.dot_general(
        v_ref[...], wv_ref[...], _PROJ_DIMS,
        preferred_element_type=jnp.float32).astype(vp_ref.dtype)


def _qkv_projection(q, k, v, wq, wk, wv, *, ts, weight_pipeline_mode):
    bs, seq, hs = q.shape
    x_spec = pl.BlockSpec((pl.Squeezed(), ts, hs), lambda b, s: (b, s, 0))
    if weight_pipeline_mode is None:
        w_spec = pl.BlockSpec((hs, hs), lambda b, s: (0, 0))
    else:
        # Constant block index -> double-buffering the weights is pure waste.
        w_spec = pl.BlockSpec((hs, hs), lambda b, s: (0, 0),
                              pipeline_mode=weight_pipeline_mode)
    out_sds = jax.ShapeDtypeStruct((bs, seq, hs), q.dtype)
    return pl.pallas_call(
        _qkv_proj_kernel,
        out_shape=(out_sds, out_sds, out_sds),
        grid_spec=pltpu.PrefetchScalarGridSpec(
            num_scalar_prefetch=0,
            grid=(bs, seq // ts),
            in_specs=[x_spec, x_spec, x_spec, w_spec, w_spec, w_spec],
            out_specs=(x_spec, x_spec, x_spec),
        ),
        compiler_params=pltpu.CompilerParams(
            dimension_semantics=("parallel", "parallel"),
            vmem_limit_bytes=_VMEM_LIMIT_BYTES),
    )(q, k, v, wq, wk, wv)


# ---------------------------------------------------------------------------
# Kernel 2: head-batched flash attention (online softmax over K blocks).
# ---------------------------------------------------------------------------
def _flash_mha_kernel(q_ref, k_ref, v_ref, o_ref, m_sc, l_sc, acc_sc, *, scale):
    # Blocks: q -> (h, tq, d_k); k/v -> (h, tk, d_k); o -> (h, tq, d_k).
    ki = pl.program_id(2)

    @pl.when(ki == 0)
    def _init():
        m_sc[...] = jnp.full_like(m_sc, -jnp.inf)
        l_sc[...] = jnp.zeros_like(l_sc)
        acc_sc[...] = jnp.zeros_like(acc_sc)

    # scores (h, tq, tk): the "K^T" is consumed via dot_general dimension
    # numbers -- no in-kernel transpose.
    s = jnp.einsum("hqd,hkd->hqk", q_ref[...], k_ref[...],
                   preferred_element_type=jnp.float32) * scale

    m_prev = m_sc[...]
    m_new = jnp.maximum(m_prev, jnp.max(s, axis=-1, keepdims=True))
    alpha = jnp.exp(m_prev - m_new)
    p = jnp.exp(s - m_new)

    l_sc[...] = alpha * l_sc[...] + jnp.sum(p, axis=-1, keepdims=True)
    acc_sc[...] = alpha * acc_sc[...] + jnp.einsum(
        "hqk,hkd->hqd", p.astype(v_ref.dtype), v_ref[...],
        preferred_element_type=jnp.float32)
    m_sc[...] = m_new

    @pl.when(ki == pl.num_programs(2) - 1)
    def _finalize():
        inv_l = pl.reciprocal(l_sc[...], approx=True)   # EUP slot: ~free
        o_ref[...] = (acc_sc[...] * inv_l).astype(o_ref.dtype)


def _flash_attention(qh, kh, vh, *, tq, tk):
    bs, h, seq, d_k = qh.shape
    scale = 1.0 / (float(d_k) ** 0.5)
    q_spec = pl.BlockSpec((pl.Squeezed(), h, tq, d_k),
                          lambda b, qi, ki: (b, 0, qi, 0))
    kv_spec = pl.BlockSpec((pl.Squeezed(), h, tk, d_k),
                           lambda b, qi, ki: (b, 0, ki, 0))
    o_spec = pl.BlockSpec((pl.Squeezed(), h, tq, d_k),
                          lambda b, qi, ki: (b, 0, qi, 0))
    kernel = functools.partial(_flash_mha_kernel, scale=scale)
    return pl.pallas_call(
        kernel,
        out_shape=jax.ShapeDtypeStruct((bs, h, seq, d_k), qh.dtype),
        grid_spec=pltpu.PrefetchScalarGridSpec(
            num_scalar_prefetch=0,
            grid=(bs, seq // tq, seq // tk),
            in_specs=[q_spec, kv_spec, kv_spec],
            out_specs=o_spec,
            scratch_shapes=[
                pltpu.VMEM((h, tq, 1), jnp.float32),    # running max  m
                pltpu.VMEM((h, tq, 1), jnp.float32),    # running sum  l
                pltpu.VMEM((h, tq, d_k), jnp.float32),  # output accumulator
            ]),
        compiler_params=pltpu.CompilerParams(
            # Two parallel axes -> v7x megacore can shard batch and q-blocks.
            dimension_semantics=("parallel", "parallel", "arbitrary"),
            vmem_limit_bytes=_VMEM_LIMIT_BYTES),
    )(qh, kh, vh)


# ---------------------------------------------------------------------------
# Public wrapper (forward pass of the PyTorch module, eval mode).
# ---------------------------------------------------------------------------
def multi_head_attention(q, k, v, wq, wk, wv, *, num_heads, mask=None,
                         block_q=128, block_k=128, block_proj=128):
    """q, k, v: (bs, seq, hidden); wq/wk/wv: (hidden, hidden) PyTorch layout.

    NOTE: the reference PyTorch module discards the result of masked_fill, so
    the mask has NO effect there; we refuse a non-None mask to make that loud.
    Dropout is eval-mode (identity).
    """
    assert mask is None, (
        "mask is a no-op in the reference module (masked_fill result is "
        "discarded); pass mask=None")
    bs, seq, hs = q.shape
    assert hs % num_heads == 0
    d_k = hs // num_heads

    def _tile(pref):
        t = min(pref, seq)
        if seq % t == 0 and (t % 8 == 0 or t == seq):
            return t
        return seq  # full-extent block is always a legal block shape

    tq, tk, ts = _tile(block_q), _tile(block_k), _tile(block_proj)

    # 1) fused Q/K/V projections (lane-dense (bs, seq, hs) outputs).
    try:
        qp, kp, vp = _qkv_projection(q, k, v, wq, wk, wv, ts=ts,
                                     weight_pipeline_mode=pl.Buffered(1))
    except Exception:
        # Fallback if this jax build does not honor pipeline_mode=Buffered(1)
        # on a top-level BlockSpec; default double-buffering is still correct.
        qp, kp, vp = _qkv_projection(q, k, v, wq, wk, wv, ts=ts,
                                     weight_pipeline_mode=None)

    # 2) wrapper-side layout plumbing: split heads into a leading batch dim,
    #    (bs, seq, hs) -> (bs, h, seq, d_k)   (mirrors the module's permute).
    def split_heads(x):
        return x.reshape(bs, seq, num_heads, d_k).transpose(0, 2, 1, 3)

    qh, kh, vh = split_heads(qp), split_heads(kp), split_heads(vp)

    # 3) head-batched flash attention (online softmax over K blocks).
    oh = _flash_attention(qh, kh, vh, tq=tq, tk=tk)

    # 4) merge heads back: (bs, h, seq, d_k) -> (bs, seq, hs).
    return oh.transpose(0, 2, 1, 3).reshape(bs, seq, hs)


# ---------------------------------------------------------------------------
# Pure-JAX reference mirroring the PyTorch forward (eval mode).
# ---------------------------------------------------------------------------
def _reference(q, k, v, wq, wk, wv, num_heads):
    bs, seq, hs = q.shape
    d_k = hs // num_heads
    qp = (q @ wq.T).reshape(bs, seq, num_heads, d_k).transpose(0, 2, 1, 3)
    kp = (k @ wk.T).reshape(bs, seq, num_heads, d_k).transpose(0, 2, 3, 1)
    vp = (v @ wv.T).reshape(bs, seq, num_heads, d_k).transpose(0, 2, 1, 3)
    score = jax.nn.softmax(jnp.matmul(qp, kp) / jnp.sqrt(d_k), axis=3)
    out = jnp.matmul(score, vp)                       # (bs, h, seq, d_k)
    return out.transpose(0, 2, 1, 3).reshape(bs, seq, hs)


if __name__ == "__main__":
    # Small shapes consistent with the module: hidden divisible by num_heads.
    bs, seq, hidden, num_heads = 2, 16, 32, 4

    key = jax.random.PRNGKey(0)
    kq, kk, kv, kwq, kwk, kwv = jax.random.split(key, 6)

    q = jax.random.normal(kq, (bs, seq, hidden), dtype=jnp.float32)
    k = jax.random.normal(kk, (bs, seq, hidden), dtype=jnp.float32)
    v = jax.random.normal(kv, (bs, seq, hidden), dtype=jnp.float32)

    # Deterministic "nn.Linear" weights, PyTorch layout (out_features, in_features).
    wscale = 1.0 / jnp.sqrt(jnp.float32(hidden))
    wq = jax.random.uniform(kwq, (hidden, hidden), jnp.float32, -wscale, wscale)
    wk = jax.random.uniform(kwk, (hidden, hidden), jnp.float32, -wscale, wscale)
    wv = jax.random.uniform(kwv, (hidden, hidden), jnp.float32, -wscale, wscale)

    # Small blocks so the test actually exercises the multi-block
    # online-softmax accumulation (grid = (bs, 2, 2)).
    out = multi_head_attention(q, k, v, wq, wk, wv, num_heads=num_heads,
                               block_q=8, block_k=8, block_proj=8)
    out = jax.block_until_ready(out)

    ref = _reference(q, k, v, wq, wk, wv, num_heads)
    assert out.shape == (bs, seq, hidden)
    # Tolerance loosened vs. the f32 reference because the softmax denominator
    # uses the EUP approximate reciprocal (pl.reciprocal(approx=True)).
    assert jnp.allclose(out, ref, atol=1e-2, rtol=1e-2), "mismatch vs reference"

    print("KERNEL_OK")
</pallas_src>

<mosaic_0001>
module attributes {stable_mosaic.version = 11 : i64} {
  func.func @_qkv_proj_kernel(%arg0: i32, %arg1: i32, %arg2: memref<1x8x32xf32, #tpu.memory_space<vmem>>, %arg3: memref<1x8x32xf32, #tpu.memory_space<vmem>>, %arg4: memref<1x8x32xf32, #tpu.memory_space<vmem>>, %arg5: memref<32x32xf32, #tpu.memory_space<vmem>>, %arg6: memref<32x32xf32, #tpu.memory_space<vmem>>, %arg7: memref<32x32xf32, #tpu.memory_space<vmem>>, %arg8: memref<1x8x32xf32, #tpu.memory_space<vmem>>, %arg9: memref<1x8x32xf32, #tpu.memory_space<vmem>>, %arg10: memref<1x8x32xf32, #tpu.memory_space<vmem>>) attributes {dimension_semantics = [#tpu.dimension_semantics<parallel>, #tpu.dimension_semantics<parallel>], iteration_bounds = array<i64: 2, 2>, scalar_prefetch = 0 : i64, scratch_operands = 0 : i64, tpu.core_type = #tpu.core_type<tc>, window_params = [{transform_indices = @transform_0, window_bounds = array<i64: 1, 8, 32>}, {transform_indices = @transform_1, window_bounds = array<i64: 1, 8, 32>}, {transform_indices = @transform_2, window_bounds = array<i64: 1, 8, 32>}, {pipeline_mode = #tpu.pipeline_mode<synchronous>, transform_indices = @transform_3, window_bounds = array<i64: 32, 32>}, {pipeline_mode = #tpu.pipeline_mode<synchronous>, transform_indices = @transform_4, window_bounds = array<i64: 32, 32>}, {pipeline_mode = #tpu.pipeline_mode<synchronous>, transform_indices = @transform_5, window_bounds = array<i64: 32, 32>}, {transform_indices = @transform_6, window_bounds = array<i64: 1, 8, 32>}, {transform_indices = @transform_7, window_bounds = array<i64: 1, 8, 32>}, {transform_indices = @transform_8, window_bounds = array<i64: 1, 8, 32>}]} {
    %c0 = arith.constant 0 : index
    %c0_0 = arith.constant 0 : index
    %c0_1 = arith.constant 0 : index
    %0 = vector.load %arg2[%c0, %c0_0, %c0_1] : memref<1x8x32xf32, #tpu.memory_space<vmem>>, vector<1x8x32xf32>
    %1 = vector.shape_cast %0 : vector<1x8x32xf32> to vector<8x32xf32>
    %c0_2 = arith.constant 0 : index
    %c0_3 = arith.constant 0 : index
    %2 = vector.load %arg5[%c0_2, %c0_3] : memref<32x32xf32, #tpu.memory_space<vmem>>, vector<32x32xf32>
    %cst = arith.constant dense<0.000000e+00> : vector<8x32xf32>
    %3 = tpu.matmul %1, %2, %cst {dimension_numbers = #tpu.dot_dimension_numbers<[1], [1], [0], [0], [0, 0, 1, 0], [], []>} : vector<8x32xf32>, vector<32x32xf32>, vector<8x32xf32> -> vector<8x32xf32>
    %c0_4 = arith.constant 0 : index
    %c0_5 = arith.constant 0 : index
    %c0_6 = arith.constant 0 : index
    %4 = vector.load %arg8[%c0_4, %c0_5, %c0_6] : memref<1x8x32xf32, #tpu.memory_space<vmem>>, vector<1x8x32xf32>
    %5 = vector.shape_cast %4 : vector<1x8x32xf32> to vector<8x32xf32>
    %6 = vector.shape_cast %3 : vector<8x32xf32> to vector<1x8x32xf32>
    tpu.vector_store %arg8[%c0_4, %c0_5, %c0_6], %6 {strides = array<i32>} : memref<1x8x32xf32, #tpu.memory_space<vmem>>, vector<1x8x32xf32>,
    %c0_7 = arith.constant 0 : index
    %c0_8 = arith.constant 0 : index
    %c0_9 = arith.constant 0 : index
    %7 = vector.load %arg3[%c0_7, %c0_8, %c0_9] : memref<1x8x32xf32, #tpu.memory_space<vmem>>, vector<1x8x32xf32>
    %8 = vector.shape_cast %7 : vector<1x8x32xf32> to vector<8x32xf32>
    %c0_10 = arith.constant 0 : index
    %c0_11 = arith.constant 0 : index
    %9 = vector.load %arg6[%c0_10, %c0_11] : memref<32x32xf32, #tpu.memory_space<vmem>>, vector<32x32xf32>
    %cst_12 = arith.constant dense<0.000000e+00> : vector<8x32xf32>
    %10 = tpu.matmul %8, %9, %cst_12 {dimension_numbers = #tpu.dot_dimension_numbers<[1], [1], [0], [0], [0, 0, 1, 0], [], []>} : vector<8x32xf32>, vector<32x32xf32>, vector<8x32xf32> -> vector<8x32xf32>
    %c0_13 = arith.constant 0 : index
    %c0_14 = arith.constant 0 : index
    %c0_15 = arith.constant 0 : index
    %11 = vector.load %arg9[%c0_13, %c0_14, %c0_15] : memref<1x8x32xf32, #tpu.memory_space<vmem>>, vector<1x8x32xf32>
    %12 = vector.shape_cast %11 : vector<1x8x32xf32> to vector<8x32xf32>
    %13 = vector.shape_cast %10 : vector<8x32xf32> to vector<1x8x32xf32>
    tpu.vector_store %arg9[%c0_13, %c0_14, %c0_15], %13 {strides = array<i32>} : memref<1x8x32xf32, #tpu.memory_space<vmem>>, vector<1x8x32xf32>,
    %c0_16 = arith.constant 0 : index
    %c0_17 = arith.constant 0 : index
    %c0_18 = arith.constant 0 : index
    %14 = vector.load %arg4[%c0_16, %c0_17, %c0_18] : memref<1x8x32xf32, #tpu.memory_space<vmem>>, vector<1x8x32xf32>
    %15 = vector.shape_cast %14 : vector<1x8x32xf32> to vector<8x32xf32>
    %c0_19 = arith.constant 0 : index
    %c0_20 = arith.constant 0 : index
    %16 = vector.load %arg7[%c0_19, %c0_20] : memref<32x32xf32, #tpu.memory_space<vmem>>, vector<32x32xf32>
    %cst_21 = arith.constant dense<0.000000e+00> : vector<8x32xf32>
    %17 = tpu.matmul %15, %16, %cst_21 {dimension_numbers = #tpu.dot_dimension_numbers<[1], [1], [0], [0], [0, 0, 1, 0], [], []>} : vector<8x32xf32>, vector<32x32xf32>, vector<8x32xf32> -> vector<8x32xf32>
    %c0_22 = arith.constant 0 : index
    %c0_23 = arith.constant 0 : index
    %c0_24 = arith.constant 0 : index
    %18 = vector.load %arg10[%c0_22, %c0_23, %c0_24] : memref<1x8x32xf32, #tpu.memory_space<vmem>>, vector<1x8x32xf32>
    %19 = vector.shape_cast %18 : vector<1x8x32xf32> to vector<8x32xf32>
    %20 = vector.shape_cast %17 : vector<8x32xf32> to vector<1x8x32xf32>
    tpu.vector_store %arg10[%c0_22, %c0_23, %c0_24], %20 {strides = array<i32>} : memref<1x8x32xf32, #tpu.memory_space<vmem>>, vector<1x8x32xf32>,
    return
  }
  func.func @transform_0(%arg0: i32, %arg1: i32) -> (i32, i32, i32) {
    %c0_i32 = arith.constant 0 : i32
    %c0_i32_0 = arith.constant 0 : i32
    return %arg0, %arg1, %c0_i32 : i32, i32, i32
  }
  func.func @transform_1(%arg0: i32, %arg1: i32) -> (i32, i32, i32) {
    %c0_i32 = arith.constant 0 : i32
    %c0_i32_0 = arith.constant 0 : i32
    return %arg0, %arg1, %c0_i32 : i32, i32, i32
  }
  func.func @transform_2(%arg0: i32, %arg1: i32) -> (i32, i32, i32) {
    %c0_i32 = arith.constant 0 : i32
    %c0_i32_0 = arith.constant 0 : i32
    return %arg0, %arg1, %c0_i32 : i32, i32, i32
  }
  func.func @transform_3(%arg0: i32, %arg1: i32) -> (i32, i32) {
    %c0_i32 = arith.constant 0 : i32
    %c0_i32_0 = arith.constant 0 : i32
    %c0_i32_1 = arith.constant 0 : i32
    return %c0_i32, %c0_i32_0 : i32, i32
  }
  func.func @transform_4(%arg0: i32, %arg1: i32) -> (i32, i32) {
    %c0_i32 = arith.constant 0 : i32
    %c0_i32_0 = arith.constant 0 : i32
    %c0_i32_1 = arith.constant 0 : i32
    return %c0_i32, %c0_i32_0 : i32, i32
  }
  func.func @transform_5(%arg0: i32, %arg1: i32) -> (i32, i32) {
    %c0_i32 = arith.constant 0 : i32
    %c0_i32_0 = arith.constant 0 : i32
    %c0_i32_1 = arith.constant 0 : i32
    return %c0_i32, %c0_i32_0 : i32, i32
  }
  func.func @transform_6(%arg0: i32, %arg1: i32) -> (i32, i32, i32) {
    %c0_i32 = arith.constant 0 : i32
    %c0_i32_0 = arith.constant 0 : i32
    return %arg0, %arg1, %c0_i32 : i32, i32, i32
  }
  func.func @transform_7(%arg0: i32, %arg1: i32) -> (i32, i32, i32) {
    %c0_i32 = arith.constant 0 : i32
    %c0_i32_0 = arith.constant 0 : i32
    return %arg0, %arg1, %c0_i32 : i32, i32, i32
  }
  func.func @transform_8(%arg0: i32, %arg1: i32) -> (i32, i32, i32) {
    %c0_i32 = arith.constant 0 : i32
    %c0_i32_0 = arith.constant 0 : i32
    return %arg0, %arg1, %c0_i32 : i32, i32, i32
  }
}

module attributes {stable_mosaic.version = 11 : i64} {
  func.func @_qkv_proj_kernel(%arg0: i32, %arg1: i32, %arg2: memref<1x8x32xf32, #tpu.memory_space<vmem>>, %arg3: memref<1x8x32xf32, #tpu.memory_space<vmem>>, %arg4: memref<1x8x32xf32, #tpu.memory_space<vmem>>, %arg5: memref<32x32xf32, #tpu.memory_space<vmem>>, %arg6: memref<32x32xf32, #tpu.memory_space<vmem>>, %arg7: memref<32x32xf32, #tpu.memory_space<vmem>>, %arg8: memref<1x8x32xf32, #tpu.memory_space<vmem>>, %arg9: memref<1x8x32xf32, #tpu.memory_space<vmem>>, %arg10: memref<1x8x32xf32, #tpu.memory_space<vmem>>) attributes {dimension_semantics = [#tpu.dimension_semantics<parallel>, #tpu.dimension_semantics<parallel>], iteration_bounds = array<i64: 2, 2>, scalar_prefetch = 0 : i64, scratch_operands = 0 : i64, tpu.core_type = #tpu.core_type<tc>, window_params = [{transform_indices = @transform_0, window_bounds = array<i64: 1, 8, 32>}, {transform_indices = @transform_1, window_bounds = array<i64: 1, 8, 32>}, {transform_indices = @transform_2, window_bounds = array<i64: 1, 8, 32>}, {pipeline_mode = #tpu.pipeline_mode<synchronous>, transform_indices = @transform_3, window_bounds = array<i64: 32, 32>}, {pipeline_mode = #tpu.pipeline_mode<synchronous>, transform_indices = @transform_4, window_bounds = array<i64: 32, 32>}, {pipeline_mode = #tpu.pipeline_mode<synchronous>, transform_indices = @transform_5, window_bounds = array<i64: 32, 32>}, {transform_indices = @transform_6, window_bounds = array<i64: 1, 8, 32>}, {transform_indices = @transform_7, window_bounds = array<i64: 1, 8, 32>}, {transform_indices = @transform_8, window_bounds = array<i64: 1, 8, 32>}]} {
    %c0 = arith.constant 0 : index
    %c0_0 = arith.constant 0 : index
    %c0_1 = arith.constant 0 : index
    %0 = vector.load %arg2[%c0, %c0_0, %c0_1] : memref<1x8x32xf32, #tpu.memory_space<vmem>>, vector<1x8x32xf32>
    %1 = vector.shape_cast %0 : vector<1x8x32xf32> to vector<8x32xf32>
    %c0_2 = arith.constant 0 : index
    %c0_3 = arith.constant 0 : index
    %2 = vector.load %arg5[%c0_2, %c0_3] : memref<32x32xf32, #tpu.memory_space<vmem>>, vector<32x32xf32>
    %cst = arith.constant dense<0.000000e+00> : vector<8x32xf32>
    %3 = tpu.matmul %1, %2, %cst {dimension_numbers = #tpu.dot_dimension_numbers<[1], [1], [0], [0], [0, 0, 1, 0], [], []>} : vector<8x32xf32>, vector<32x32xf32>, vector<8x32xf32> -> vector<8x32xf32>
    %c0_4 = arith.constant 0 : index
    %c0_5 = arith.constant 0 : index
    %c0_6 = arith.constant 0 : index
    %4 = vector.load %arg8[%c0_4, %c0_5, %c0_6] : memref<1x8x32xf32, #tpu.memory_space<vmem>>, vector<1x8x32xf32>
    %5 = vector.shape_cast %4 : vector<1x8x32xf32> to vector<8x32xf32>
    %6 = vector.shape_cast %3 : vector<8x32xf32> to vector<1x8x32xf32>
    tpu.vector_store %arg8[%c0_4, %c0_5, %c0_6], %6 {strides = array<i32>} : memref<1x8x32xf32, #tpu.memory_space<vmem>>, vector<1x8x32xf32>,
    %c0_7 = arith.constant 0 : index
    %c0_8 = arith.constant 0 : index
    %c0_9 = arith.constant 0 : index
    %7 = vector.load %arg3[%c0_7, %c0_8, %c0_9] : memref<1x8x32xf32, #tpu.memory_space<vmem>>, vector<1x8x32xf32>
    %8 = vector.shape_cast %7 : vector<1x8x32xf32> to vector<8x32xf32>
    %c0_10 = arith.constant 0 : index
    %c0_11 = arith.constant 0 : index
    %9 = vector.load %arg6[%c0_10, %c0_11] : memref<32x32xf32, #tpu.memory_space<vmem>>, vector<32x32xf32>
    %cst_12 = arith.constant dense<0.000000e+00> : vector<8x32xf32>
    %10 = tpu.matmul %8, %9, %cst_12 {dimension_numbers = #tpu.dot_dimension_numbers<[1], [1], [0], [0], [0, 0, 1, 0], [], []>} : vector<8x32xf32>, vector<32x32xf32>, vector<8x32xf32> -> vector<8x32xf32>
    %c0_13 = arith.constant 0 : index
    %c0_14 = arith.constant 0 : index
    %c0_15 = arith.constant 0 : index
    %11 = vector.load %arg9[%c0_13, %c0_14, %c0_15] : memref<1x8x32xf32, #tpu.memory_space<vmem>>, vector<1x8x32xf32>
    %12 = vector.shape_cast %11 : vector<1x8x32xf32> to vector<8x32xf32>
    %13 = vector.shape_cast %10 : vector<8x32xf32> to vector<1x8x32xf32>
    tpu.vector_store %arg9[%c0_13, %c0_14, %c0_15], %13 {strides = array<i32>} : memref<1x8x32xf32, #tpu.memory_space<vmem>>, vector<1x8x32xf32>,
    %c0_16 = arith.constant 0 : index
    %c0_17 = arith.constant 0 : index
    %c0_18 = arith.constant 0 : index
    %14 = vector.load %arg4[%c0_16, %c0_17, %c0_18] : memref<1x8x32xf32, #tpu.memory_space<vmem>>, vector<1x8x32xf32>
    %15 = vector.shape_cast %14 : vector<1x8x32xf32> to vector<8x32xf32>
    %c0_19 = arith.constant 0 : index
    %c0_20 = arith.constant 0 : index
    %16 = vector.load %arg7[%c0_19, %c0_20] : memref<32x32xf32, #tpu.memory_space<vmem>>, vector<32x32xf32>
    %cst_21 = arith.constant dense<0.000000e+00> : vector<8x32xf32>
    %17 = tpu.matmul %15, %16, %cst_21 {dimension_numbers = #tpu.dot_dimension_numbers<[1], [1], [0], [0], [0, 0, 1, 0], [], []>} : vector<8x32xf32>, vector<32x32xf32>, vector<8x32xf32> -> vector<8x32xf32>
    %c0_22 = arith.constant 0 : index
    %c0_23 = arith.constant 0 : index
    %c0_24 = arith.constant 0 : index
    %18 = vector.load %arg10[%c0_22, %c0_23, %c0_24] : memref<1x8x32xf32, #tpu.memory_space<vmem>>, vector<1x8x32xf32>
    %19 = vector.shape_cast %18 : vector<1x8x32xf32> to vector<8x32xf32>
    %20 = vector.shape_cast %17 : vector<8x32xf32> to vector<1x8x32xf32>
    tpu.vector_store %arg10[%c0_22, %c0_23, %c0_24], %20 {strides = array<i32>} : memref<1x8x32xf32, #tpu.memory_space<vmem>>, vector<1x8x32xf32>,
    return
  }
  func.func @transform_0(%arg0: i32, %arg1: i32) -> (i32, i32, i32) {
    %c0_i32 = arith.constant 0 : i32
    %c0_i32_0 = arith.constant 0 : i32
    return %arg0, %arg1, %c0_i32 : i32, i32, i32
  }
  func.func @transform_1(%arg0: i32, %arg1: i32) -> (i32, i32, i32) {
    %c0_i32 = arith.constant 0 : i32
    %c0_i32_0 = arith.constant 0 : i32
    return %arg0, %arg1, %c0_i32 : i32, i32, i32
  }
  func.func @transform_2(%arg0: i32, %arg1: i32) -> (i32, i32, i32) {
    %c0_i32 = arith.constant 0 : i32
    %c0_i32_0 = arith.constant 0 : i32
    return %arg0, %arg1, %c0_i32 : i32, i32, i32
  }
  func.func @transform_3(%arg0: i32, %arg1: i32) -> (i32, i32) {
    %c0_i32 = arith.constant 0 : i32
    %c0_i32_0 = arith.constant 0 : i32
    %c0_i32_1 = arith.constant 0 : i32
    return %c0_i32, %c0_i32_0 : i32, i32
  }
  func.func @transform_4(%arg0: i32, %arg1: i32) -> (i32, i32) {
    %c0_i32 = arith.constant 0 : i32
    %c0_i32_0 = arith.constant 0 : i32
    %c0_i32_1 = arith.constant 0 : i32
    return %c0_i32, %c0_i32_0 : i32, i32
  }
  func.func @transform_5(%arg0: i32, %arg1: i32) -> (i32, i32) {
    %c0_i32 = arith.constant 0 : i32
    %c0_i32_0 = arith.constant 0 : i32
    %c0_i32_1 = arith.constant 0 : i32
    return %c0_i32, %c0_i32_0 : i32, i32
  }
  func.func @transform_6(%arg0: i32, %arg1: i32) -> (i32, i32, i32) {
    %c0_i32 = arith.constant 0 : i32
    %c0_i32_0 = arith.constant 0 : i32
    return %arg0, %arg1, %c0_i32 : i32, i32, i32
  }
  func.func @transform_7(%arg0: i32, %arg1: i32) -> (i32, i32, i32) {
    %c0_i32 = arith.constant 0 : i32
    %c0_i32_0 = arith.constant 0 : i32
    return %arg0, %arg1, %c0_i32 : i32, i32, i32
  }
  func.func @transform_8(%arg0: i32, %arg1: i32) -> (i32, i32, i32) {
    %c0_i32 = arith.constant 0 : i32
    %c0_i32_0 = arith.constant 0 : i32
    return %arg0, %arg1, %c0_i32 : i32, i32, i32
  }
}

</mosaic_0001>

<bundles_post_ra>
// kernel: tpu_custom_call.1
= control target key start
LH: loop header
LB: loop body
LE: loop exit
PB: predicated region body
PF: predicated region fallthrough
CT: control target
= control target key end

     0   :  { %s2173_s0 = inlined_call_operand.hbm [shape: f32[2,16,32], index: 0, kind: input, shape index: {}]   ;;  %s2174_s1 = inlined_call_operand.hbm [shape: f32[2,16,32], index: 1, kind: input, shape index: {}]   ;;  %s2175_s2 = inlined_call_operand.hbm [shape: f32[2,16,32], index: 2, kind: input, shape index: {}]   ;;  %s2176_s3 = inlined_call_operand.hbm [shape: f32[32,32], index: 3, kind: input, shape index: {}]   ;;  %s2177_s4 = inlined_call_operand.hbm [shape: f32[32,32], index: 4, kind: input, shape index: {}]   ;;  %s2178_s5 = inlined_call_operand.hbm [shape: f32[32,32], index: 5, kind: input, shape index: {}]   ;;  %s2179_s6 = inlined_call_operand.hbm [shape: f32[2,16,32], index: 6, kind: output, shape index: {0}]   ;;  %s2180_s7 = inlined_call_operand.hbm [shape: f32[2,16,32], index: 7, kind: output, shape index: {1}]   ;;  %s2181_s8 = inlined_call_operand.hbm [shape: f32[2,16,32], index: 8, kind: output, shape index: {2}]  }
   0x1   :  { %2213 = sst [smem:[#allocation33_spill]] %s2174_s1 }
   0x2   :  { %2214 = sst [smem:[#allocation34_spill]] %s2176_s3 }
   0x3   :  { %2215 = sst [smem:[#allocation35_spill]] %s2179_s6 }
   0x4   :  { %2216 = sst [smem:[#allocation36_spill]] %s2180_s7 }
   0x5   :  { %2217 = sst [smem:[#allocation37_spill]] %s2181_s8 }
   0x6   :  { %14 = vsyncpa [#allocation3], 0 }
   0x7   :  { %16 = vsyncpa [#allocation3 + $0x1], 0 }
   0x8   :  { %17 = vsyncpa [#allocation6], 0 }
   0x9   :  { %19 = vsyncpa [#allocation6 + $0x1], 0 }
   0xa   :  { %20 = vsyncpa [#allocation9], 0 }
   0xb   :  { %21 = vsyncpa [#allocation12], 0 }
   0xc   :  { %22 = vsyncpa [#allocation4], 0 }
   0xd   :  { %24 = vsyncpa [#allocation4 + $0x1], 0 }
   0xe   :  { %25 = vsyncpa [#allocation15], 0 }
   0xf   :  { %27 = vsyncpa [#allocation15 + $0x1], 0  ;;  %s1703_s27 = smov 0   ;;  %s1705_s28 = smov 0  }
  0x10   :  { %s1707_s29 = smov 0   ;;  %s1709_s30 = smov 0  }
  0x11   :  { %s1711_s9 = smov 0   ;;  %s1713_s10 = smov 0  }
  0x12   :  { %s1715_s11 = smov 0   ;;  %s1717_s12 = smov 0  }
  0x13 LB: > { %2218 = sst [smem:[#allocation23_spill]] %s1614_s27  ;;  %s1744_s13 = sadd.s32 4294967295, %s1642_s12   ;;  %s1642_s12 = sphi %s1717_s12, %s33_s12   ;;  %s1638_s11 = sphi %s1715_s11, %s2273_s11   ;;  %s1634_s10 = sphi %s1713_s10, %s2272_s10   ;;  %s1630_s9 = sphi %s1711_s9, %s2271_s9   ;;  %s1626_s30 = sphi %s1709_s30, %s2270_s30   ;;  %s1622_s29 = sphi %s1707_s29, %s2276_s29   ;;  %s1618_s28 = sphi %s1705_s28, %s2275_s28   ;;  %s1614_s27 = sphi %s1703_s27, %s2274_s27  }
  0x14   : > { %2219 = sst [smem:[#allocation24_spill]] %s1626_s30  ;;  %s2182_s14 = sadd.s32 4294967294, %s1642_s12  }
  0x15   : > { %2220 = sst [smem:[#allocation25_spill]] %s1634_s10  ;;  %p67_p0 = scmp.ne.s32.totalorder %s1618_s28, %s1614_s27 }
  0x16   : > { %2221 = sst [smem:[#allocation26_spill]] %s1638_s11  ;;  %p2183_p1 = scmp.eq.s32.totalorder %s1744_s13, 0 }
  0x17   : > { %2222 = sst [smem:[#allocation27_spill]] %s1642_s12  ;;  %p218_p3 = scmp.eq.s32.totalorder %s2182_s14, 3 }
  0x18   : > { %p1755_p4 = por %p2183_p1, %p67_p0  ;;  %p1042_p5 = scmp.ge.s32.totalorder %s1642_s12, 1 }
  0x19   : > { %p1760_p6 = por %p218_p3, %p67_p0  ;;  %p281_p7 = scmp.lt.s32.totalorder %s1642_s12, 5 }
  0x1a   : > { %s2223_s15 = scalar_select %p1755_p4, 1, 0 }
  0x1b   : > { %s2224_s16 = scalar_select %p1760_p6, 1, 0 }
  0x1c   : > { %p1765_p8 = pnand %p1042_p5, %p281_p7  ;;  %s1644_s18 = smov [#allocation8]  }
  0x1d   : > { %2225 = sst [smem:[#allocation28_spill]] %s2224_s16  ;;  %s293_s19 = sshll.u32 %s1644_s18, 4  ;;  %s294_s19 = int_to_ptr.vmem [resolvable:$true] %s293_s19 }
  0x1e   : > { %s2226_s17 = scalar_select %p1765_p8, 1, 0 }
  0x1f   : > { %p1188_p9 = pneg %p1765_p8  ;;  %s2228_s3 = sld [smem:[#allocation34_spill]] }
  0x21   : > { %p1773_p10 = pnand %p1188_p9, %p2183_p1 }
  0x23   : > { %s2227_s20 = scalar_select %p1773_p10, 1, 0 }
  0x24   : > { %p1785_p12 = pneg %p1773_p10 }
  0x25   : > { %s1298_s23 = scalar_lea.hbm %s2228_s3, 512 }
  0x26   : > { %p1299_p11 = scmp.ne.s32.totalorder %s2228_s3, %s1298_s23  ;;  %p1305_p3 = scmp.lt.u32.totalorder %s1298_s23, %s2228_s3 }
  0x27   : > { %s2229_s26 = scalar_select %p1785_p12, 1, 0 }
  0x28   : > { %p1301_p13 = pnand %p1785_p12, %p1299_p11 }
  0x2a   : > { %p1302_p0 = pneg %p1301_p13 }
  0x2c   : > { %p1307_p5 = pnand %p1305_p3, %p1302_p0 }
  0x2e   : > { %1310 = shalt.err (!%p1307_p5)
}
  0x2f   : > { %s1311_s21 = scalar_lea.vmem %s294_s19, 512  ;;  %p1319_p2 = scmp.lt.s32.totalorder %s294_s19, %s294_s19 }
  0x30   : > { %p1312_p7 = scmp.ne.s32.totalorder %s294_s19, %s1311_s21  ;;  %p1320_p6 = scmp.lt.s32.totalorder %s1311_s21, %s1311_s21 }
  0x32   : > { %p1314_p9 = pnand %p1312_p7, %p1785_p12  ;;  %p1321_p4 = por %p1320_p6, %p1319_p2 }
  0x34   : > { %p1315_p1 = pneg %p1314_p9 }
  0x36   : > { %p1322_p8 = pnand %p1321_p4, %p1315_p1 }
  0x38   : > { %1325 = shalt.err (!%p1322_p8)
}
  0x39   : > { %s2187_s22 = smov 128   ;;  %s2189_s14 = smov 8  }
  0x3a   : > { %1191 = dma.hbm_to_vmem [thread:$0]  (!%p1773_p10), %s2228_s3, 512, %s294_s19, [#allocation9], %s2187_s22, %s2187_s22, %s2189_s14  }
  0x3b   : > { %s42_s25 = sadd.s32 1, %s1634_s10  ;;  %s45_s18 = sadd.s32 1, %s1638_s11 }
  0x3c   : > { %p43_p1 = scmp.ge.s32.totalorder %s42_s25, 2  ;;  %s54_s21 = sadd.s32 1, %s1622_s29 }
  0x3d   : > { %p61_p2 = scmp.ne.s32.totalorder %s1622_s29, %s1618_s28  ;;  %p62_p4 = scmp.eq.s32.totalorder %s1642_s12, 0 }
  0x3e   : > { %s2278_s25 = smov (%p43_p1, %s42_s25), 0  ;;  %s2280_s18 = smov (!%p43_p1, %s45_s18), %s1638_s11 }
  0x3f   : > { %2230 = sst [smem:[#allocation29_spill]] %s2278_s25  ;;  %s50_s16 = ssub.s32 %s1634_s10, %s2278_s25 }
  0x40   : > { %p47_p6 = scmp.ge.s32.totalorder %s2280_s18, 2  ;;  %p2231_p8 = scmp.eq.s32.totalorder %s1744_s13, 3 }
  0x41   : > { %p63_p13 = por %p62_p4, %p61_p2  ;;  %p1221_p0 = scmp.lt.s32.totalorder %s1642_s12, 4 }
  0x42   : > { %p1817_p11 = por %p2231_p8, %p61_p2  ;;  %s2282_s18 = smov (%p47_p6, %s2280_s18), 0 }
  0x43   : > { %2234 = sst [smem:[#allocation31_spill]] %s2282_s18  ;;  %s2199_s23 = sand.u32 1, %s1622_s29  }
  0x44   : > { %s2232_s19 = scalar_select %p1817_p11, 1, 0 }
  0x45   : > { %s1048_s24 = sshll.u32 %s1638_s11, 1  ;;  %s49_s22 = ssub.s32 %s1638_s11, %s2282_s18 }
  0x46   : > { %2233 = sst [smem:[#allocation30_spill]] %s2232_s19  ;;  %s1830_s14 = sshll.u32 %s2199_s23, 3 }
  0x47   : > { %s51_s3 = sor.u32 %s50_s16, %s49_s22  ;;  %s342_s25 = sadd.s32 %s1634_s10, %s1048_s24 }
  0x48   : > { %p52_p3 = scmp.eq.s32.totalorder %s51_s3, 0  ;;  %s1833_s27 = sshll.u32 %s342_s25, 7 }
  0x49   : > { %p1835_p5 = pnand %p1221_p0, %p63_p13  ;;  %s353_s7 = sand.u32 1, %s1642_s12  }
  0x4a   : > { %s1841_s6 = scalar_select %p52_p3, %s1622_s29, %s54_s21  }
  0x4b   : > { %s2235_s8 = scalar_select %p1835_p5, 1, 0 }
  0x4c   : > { %2236 = sst [smem:[#allocation32_spill]] %s1841_s6  ;;  %s2237_s1 = sld [smem:[#allocation33_spill]] }
  0x4d   : > { %s357_s3 = scalar_lea.vmem [#allocation5], %s1830_s14  ;;  %s1647_s22 = smov [#allocation10]  }
  0x4e   : > { %s366_s16 = sshll.u32 %s357_s3, 4  ;;  %s1852_s25 = sshll.u32 %s1647_s22, 4  ;;  %s1850_s16 = int_to_ptr.vmem [resolvable:$true] %s366_s16  ;;  %s307_s25 = int_to_ptr.vmem [resolvable:$true] %s1852_s25 }
  0x4f   : > { %s1854_s24 = scalar_lea.sflag [#allocation6], %s353_s7  ;;  %p1860_p9 = pneg %p1835_p5 }
  0x51   : > { %s2238_s18 = scalar_select %p1860_p9, 1, 0 }
  0x52   : > { %s1847_s23 = scalar_lea.hbm %s2237_s1, %s1833_s27  ;;  %s1331_s11 = scalar_lea.hbm %s2237_s1, 512 }
  0x53   : > { %s1326_s21 = scalar_lea.hbm %s1847_s23, 128  ;;  %p1332_p4 = scmp.lt.u32.totalorder %s1847_s23, %s2237_s1 }
  0x54   : > { %p1327_p7 = scmp.ne.s32.totalorder %s1847_s23, %s1326_s21  ;;  %p1333_p6 = scmp.lt.u32.totalorder %s1331_s11, %s1326_s21 }
  0x55   : > { %p1335_p13 = scmp.lt.u32.totalorder %s1326_s21, %s1847_s23 }
  0x56   : > { %p1329_p1 = pnand %p1860_p9, %p1327_p7  ;;  %p1334_p8 = por %p1333_p6, %p1332_p4 }
  0x58   : > { %p1330_p2 = pneg %p1329_p1  ;;  %p1336_p0 = por %p1335_p13, %p1334_p8 }
  0x5a   : > { %p1337_p3 = pnand %p1336_p0, %p1330_p2 }
  0x5c   : > { %1340 = shalt.err (!%p1337_p3)
}
  0x5d   : > { %s1341_s7 = scalar_lea.vmem %s1850_s16, 128  ;;  %s1648_s19 = smov [#allocation5]  }
  0x5e   : > { %p1342_p7 = scmp.ne.s32.totalorder %s1850_s16, %s1341_s7  ;;  %s1346_s3 = sshll.u32 %s1648_s19, 4  ;;  %s1347_s3 = int_to_ptr.vmem [resolvable:$false] %s1346_s3 }
  0x5f   : > { %s1348_s10 = scalar_lea.vmem %s1347_s3, 256  ;;  %p1349_p10 = scmp.lt.s32.totalorder %s1850_s16, %s1347_s3 }
  0x60   : > { %p1344_p1 = pnand %p1342_p7, %p1860_p9  ;;  %p1350_p12 = scmp.lt.s32.totalorder %s1348_s10, %s1341_s7 }
  0x62   : > { %p1345_p11 = pneg %p1344_p1  ;;  %p1351_p4 = por %p1350_p12, %p1349_p10 }
  0x64   : > { %p1352_p6 = pnand %p1351_p4, %p1345_p11 }
  0x66   : > { %1355 = shalt.err (!%p1352_p6)
}
  0x67   : > { %1204 = dma.hbm_to_vmem [thread:$0]  (!%p1835_p5), %s1847_s23, 128, %s1850_s16, %s1854_s24  }
  0x68   : > { %s1356_s22 = scalar_lea.hbm %s2177_s4, 512  ;;  %p2239_p10 = scmp.ne.s32.totalorder %s2229_s26, 0 }
  0x69   : > { %p1357_p2 = scmp.ne.s32.totalorder %s2177_s4, %s1356_s22  ;;  %p1363_p8 = scmp.lt.u32.totalorder %s1356_s22, %s2177_s4 }
  0x6b   : > { %p1359_p12 = pnand %p1357_p2, %p2239_p10 }
  0x6d   : > { %p1360_p11 = pneg %p1359_p12 }
  0x6f   : > { %p1365_p13 = pnand %p1363_p8, %p1360_p11 }
  0x71   : > { %1368 = shalt.err (!%p1365_p13)
}
  0x72   : > { %s1369_s10 = scalar_lea.vmem %s307_s25, 512  ;;  %p1377_p1 = scmp.lt.s32.totalorder %s307_s25, %s307_s25 }
  0x73   : > { %p1370_p0 = scmp.ne.s32.totalorder %s307_s25, %s1369_s10  ;;  %p1378_p4 = scmp.lt.s32.totalorder %s1369_s10, %s1369_s10 }
  0x75   : > { %p1372_p3 = pnand %p1370_p0, %p2239_p10  ;;  %p1379_p6 = por %p1378_p4, %p1377_p1 }
  0x77   : > { %p1373_p7 = pneg %p1372_p3 }
  0x79   : > { %p1380_p5 = pnand %p1379_p6, %p1373_p7 }
  0x7b   : > { %1383 = shalt.err (!%p1380_p5)
}
  0x7c   : > { %p2240_p2 = scmp.ne.s32.totalorder %s2227_s20, 0  ;;  %s2241_s1 = smov 8  }
  0x7d   : > { %s2242_s23 = smov 128   ;;  %s1649_s21 = smov [#allocation11]  }
  0x7e   : > { %1194 = dma.hbm_to_vmem [thread:$0]  (!%p2240_p2), %s2177_s4, 512, %s307_s25, [#allocation9], %s2242_s23, %s2242_s23, %s2241_s1  }
  0x7f   : > { %s319_s22 = sshll.u32 %s1649_s21, 4  ;;  %s1384_s3 = scalar_lea.hbm %s2178_s5, 512  ;;  %s320_s22 = int_to_ptr.vmem [resolvable:$true] %s319_s22 }
  0x80   : > { %p1385_p5 = scmp.ne.s32.totalorder %s2178_s5, %s1384_s3  ;;  %p1391_p8 = scmp.lt.u32.totalorder %s1384_s3, %s2178_s5 }
  0x82   : > { %p1387_p12 = pnand %p1385_p5, %p2239_p10 }
  0x84   : > { %p1388_p11 = pneg %p1387_p12 }
  0x86   : > { %p1393_p13 = pnand %p1391_p8, %p1388_p11 }
  0x88   : > { %1396 = shalt.err (!%p1393_p13)
}
  0x89   : > { %s1397_s25 = scalar_lea.vmem %s320_s22, 512  ;;  %p1405_p1 = scmp.lt.s32.totalorder %s320_s22, %s320_s22 }
  0x8a   : > { %p1398_p0 = scmp.ne.s32.totalorder %s320_s22, %s1397_s25  ;;  %p1406_p4 = scmp.lt.s32.totalorder %s1397_s25, %s1397_s25 }
  0x8c   : > { %p1400_p3 = pnand %p1398_p0, %p2239_p10  ;;  %p1407_p6 = por %p1406_p4, %p1405_p1 }
  0x8e   : > { %p1401_p7 = pneg %p1400_p3 }
  0x90   : > { %p1408_p9 = pnand %p1407_p6, %p1401_p7 }
  0x92   : > { %1411 = shalt.err (!%p1408_p9)
}
  0x93   : > { %1197 = dma.hbm_to_vmem [thread:$0]  (!%p2240_p2), %s2178_s5, 512, %s320_s22, [#allocation12], %s2242_s23, %s2242_s23, %s2241_s1  }
  0x94   : > { %s1931_s16 = scalar_lea.hbm %s2173_s0, %s1833_s27  ;;  %s337_s20 = scalar_lea.vmem [#allocation2], %s1830_s14 }
  0x95   : > { %s346_s11 = sshll.u32 %s337_s20, 4  ;;  %s2243_s21 = sand.u32 1, %s1622_s29   ;;  %s347_s11 = int_to_ptr.vmem [resolvable:$true] %s346_s11 }
  0x96   : > { %s334_s19 = scalar_lea.sflag [#allocation3], %s2243_s21  ;;  %s1412_s7 = scalar_lea.hbm %s1931_s16, 128 }
  0x97   : > { %p1413_p9 = scmp.ne.s32.totalorder %s1931_s16, %s1412_s7  ;;  %p2244_p10 = scmp.ne.s32.totalorder %s2238_s18, 0 }
  0x98   : > { %s1417_s22 = scalar_lea.hbm %s2173_s0, 512  ;;  %p1418_p2 = scmp.lt.u32.totalorder %s1931_s16, %s2173_s0 }
  0x99   : > { %p1415_p5 = pnand %p1413_p9, %p2244_p10  ;;  %p1419_p11 = scmp.lt.u32.totalorder %s1417_s22, %s1412_s7 }
  0x9a   : > { %p1421_p13 = scmp.lt.u32.totalorder %s1412_s7, %s1931_s16 }
  0x9b   : > { %p1416_p12 = pneg %p1415_p5  ;;  %p1420_p8 = por %p1419_p11, %p1418_p2 }
  0x9d   : > { %p1422_p0 = por %p1421_p13, %p1420_p8 }
  0x9f   : > { %p1423_p3 = pnand %p1422_p0, %p1416_p12 }
  0xa1   : > { %1426 = shalt.err (!%p1423_p3)
}
  0xa2   : > { %s1427_s25 = scalar_lea.vmem %s347_s11, 128  ;;  %s1650_s6 = smov [#allocation2]  }
  0xa3   : > { %p1428_p7 = scmp.ne.s32.totalorder %s347_s11, %s1427_s25  ;;  %s1432_s30 = sshll.u32 %s1650_s6, 4  ;;  %s1433_s30 = int_to_ptr.vmem [resolvable:$false] %s1432_s30 }
  0xa4   : > { %s1434_s12 = scalar_lea.vmem %s1433_s30, 256  ;;  %p1435_p6 = scmp.lt.s32.totalorder %s347_s11, %s1433_s30 }
  0xa5   : > { %p1430_p1 = pnand %p1428_p7, %p2244_p10  ;;  %p1436_p9 = scmp.lt.s32.totalorder %s1434_s12, %s1427_s25 }
  0xa7   : > { %p1431_p4 = pneg %p1430_p1  ;;  %p1437_p5 = por %p1436_p9, %p1435_p6 }
  0xa9   : > { %p1438_p2 = pnand %p1437_p5, %p1431_p4 }
  0xab   : > { %1441 = shalt.err (!%p1438_p2)
}
  0xac   : > { %p2245_p11 = scmp.ne.s32.totalorder %s2235_s8, 0  ;;  %s1957_s21 = scalar_lea.hbm %s2175_s2, %s1833_s27 }
  0xad   : > { %s377_s7 = scalar_lea.vmem [#allocation7], %s1830_s14  ;;  %s1442_s23 = scalar_lea.hbm %s1957_s21, 128 }
  0xae   : > { %1201 = dma.hbm_to_vmem [thread:$0]  (!%p2245_p11), %s1931_s16, 128, %s347_s11, %s334_s19  }
  0xaf   : > { %s386_s1 = sshll.u32 %s377_s7, 4  ;;  %p1443_p12 = scmp.ne.s32.totalorder %s1957_s21, %s1442_s23  ;;  %s387_s1 = int_to_ptr.vmem [resolvable:$true] %s386_s1 }
  0xb0   : > { %s1447_s16 = scalar_lea.hbm %s2175_s2, 512  ;;  %p1448_p0 = scmp.lt.u32.totalorder %s1957_s21, %s2175_s2 }
  0xb1   : > { %p1445_p8 = pnand %p1443_p12, %p2244_p10  ;;  %p1449_p3 = scmp.lt.u32.totalorder %s1447_s16, %s1442_s23 }
  0xb2   : > { %p1451_p1 = scmp.lt.u32.totalorder %s1442_s23, %s1957_s21 }
  0xb3   : > { %p1446_p13 = pneg %p1445_p8  ;;  %p1450_p7 = por %p1449_p3, %p1448_p0 }
  0xb5   : > { %p1452_p4 = por %p1451_p1, %p1450_p7 }
  0xb7   : > { %p1453_p6 = pnand %p1452_p4, %p1446_p13 }
  0xb9   : > { %1456 = shalt.err (!%p1453_p6)
}
  0xba   : > { %s1457_s27 = scalar_lea.vmem %s387_s1, 128  ;;  %s1651_s14 = smov [#allocation7]  }
  0xbb   : > { %p1458_p9 = scmp.ne.s32.totalorder %s387_s1, %s1457_s27  ;;  %s1462_s10 = sshll.u32 %s1651_s14, 4  ;;  %s1463_s10 = int_to_ptr.vmem [resolvable:$false] %s1462_s10 }
  0xbc   : > { %s1464_s25 = scalar_lea.vmem %s1463_s10, 256  ;;  %p1465_p12 = scmp.lt.s32.totalorder %s387_s1, %s1463_s10 }
  0xbd   : > { %p1460_p5 = pnand %p1458_p9, %p2244_p10  ;;  %p1466_p8 = scmp.lt.s32.totalorder %s1464_s25, %s1457_s27 }
  0xbf   : > { %p1461_p2 = pneg %p1460_p5  ;;  %p1467_p11 = por %p1466_p8, %p1465_p12 }
  0xc1   : > { %p1468_p0 = pnand %p1467_p11, %p1461_p2 }
  0xc3   : > { %1471 = shalt.err (!%p1468_p0)
}
  0xc4   : > { %p2246_p3 = scmp.ne.s32.totalorder %s2235_s8, 0  ;;  %p2247_p13 = scmp.ne.s32.totalorder %s2226_s17, 0 }
  0xc5   : > { %s1981_s18 = sand.u32 (!%p2247_p13), 1, %s1618_s28   ;;  %p2248_p10 = scmp.ne.s32.totalorder (!%p2247_p13), %s2223_s15, 0 }
  0xc6   : > { %1207 = dma.hbm_to_vmem [thread:$0]  (!%p2246_p3), %s1957_s21, 128, %s387_s1, %s1854_s24  }
  0xc7   : > { %395 = sbr.rel (%p2247_p13) target bundleno = 509 (0x1fd), region = 44  ;;  %s1984_s6 = sshll.u32 (!%p2247_p13), %s1981_s18, 3 }
  0xc8   : > { %s398_s30 = scalar_lea.sflag (!%p2247_p13), [#allocation3], %s1981_s18  ;;  %s401_s12 = scalar_lea.vmem (!%p2247_p13), [#allocation2], %s1984_s6 }
  0xce   : > { %1589 = dma.done.wait (%p2248_p10), %s398_s30, 128  }
  0xcf   : > { %1591 = vsyncadd (%p2248_p10), %s398_s30, 4294967168  ;;  %s406_s8 = sand.u32 1, %s1744_s13   ;;  %s410_s24 = scalar_lea.vmem [#allocation5], %s1984_s6 }
  0xd0   : > { %s407_s17 = scalar_lea.sflag [#allocation6], %s406_s8 }
  0xd1   : > { %1593 = dma.done.wait (%p2248_p10), %s407_s17, 256  }
  0xd2   : > { %1595 = vsyncadd (%p2248_p10), %s407_s17, 4294967040  ;;  %s419_s26 = scalar_lea.vmem [#allocation7], %s1984_s6  ;;  %p2249_p11 = scmp.eq.s32.totalorder %s1744_s13, 0 }
  0xd4   : > { %1597 = dma.done.wait (%p2249_p11), [#allocation9], 1024   ;;  %p2250_p7 = pmov %p2249_p11 }
  0xd6   : > { %1599 = vsyncadd (%p2250_p7), [#allocation9], 4294966272  ;;  %p2251_p1 = pmov %p2250_p7 }
  0xd8   : > { %1601 = dma.done.wait (%p2251_p1), [#allocation12], 512   ;;  %p2252_p4 = pmov %p2251_p1 }
  0xd9   : > { %v1652_v0 = vmov 0.0|0.0   ;;  %vm1653_vm0 = vmmov 0   ;;  %v1654_v1 = vmov 0.0   ;;  %vm489_vm1 = vcmask 261120   ;;  %v485_v2 = vld [vmem:[#allocation8] sm:$0xff]  ;;  %v486_v3 = vld [vmem:[#allocation8 + $0x8] sm:$0xff] }
  0xda   : > { %1603 = vsyncadd (%p2252_p4), [#allocation12], 4294966784  ;;  %1140 = vmatprep.subr.bf16.mxu0 %v1652_v0  ;;  %1148 = vmatprep.subr.bf16.mxu1 %v1652_v0  ;;  %v1141_v5 = vpack.c.bf16 %v486_v3, %v485_v2  ;;  %v577_v6 = vld [vmem:[#allocation10] sm:$0xff]  ;;  %v578_v7 = vld [vmem:[#allocation10 + $0x8] sm:$0xff]  ;;  %s2255_s15 = sld [smem:[#allocation24_spill]]  ;;  %s1084_s20 = sshll.u32 %s1630_s9, 1 }
  0xdb   : > { %1115 = vmatprep.mubr.msk.f32.mxu0 %vm1653_vm0, %v1654_v1  ;;  %1126 = vmatprep.mubr.msk.f32.mxu1 %vm1653_vm0, %v1654_v1  ;;  %vm2013_vm2 = vmpackc.low %vm489_vm1, %vm489_vm1  ;;  %v1149_v8 = vpack.c.bf16 %v578_v7, %v577_v6  ;;  %v487_v9 = vld [vmem:[#allocation8 + $0x10] sm:$0xff]  ;;  %v488_v10 = vld [vmem:[#allocation8 + $0x18] sm:$0xff]  ;;  %s469_s1 = scalar_lea.vmem [#allocation13], %s1984_s6  ;;  %s2256_s22 = sld [smem:[#allocation30_spill]] }
  0xdc   : > { %1143 = vmatpush3.bf16.xpose.msk.msra.mxu0 %vm2013_vm2, %v1141_v5  ;;  %v579_v11 = vld [vmem:[#allocation10 + $0x10] sm:$0xff]  ;;  %v580_v12 = vld [vmem:[#allocation10 + $0x18] sm:$0xff]  ;;  %v1145_v13 = vpack.c.bf16 %v488_v10, %v487_v9  ;;  %v668_v15 = vld [vmem:[#allocation11] sm:$0xff]  ;;  %s784_s23 = sshll.u32 %s469_s1, 4  ;;  %s476_s3 = scalar_lea.vmem [#allocation14], %s1984_s6  ;;  %s2051_s23 = int_to_ptr.vmem [resolvable:$true] %s784_s23 }
  0xdd   : > { %1144 = vmatprep.subr.bf16.mxu0 %v1652_v0  ;;  %1151 = vmatpush3.bf16.xpose.msk.msra.mxu1 %vm2013_vm2, %v1149_v8  ;;  %v1153_v14 = vpack.c.bf16 %v580_v12, %v579_v11  ;;  %v669_v16 = vld [vmem:[#allocation11 + $0x8] sm:$0xff]  ;;  %v484_v17 = vld [vmem:[%s401_s12] sm:$0xff]  ;;  %s799_s16 = sshll.u32 %s476_s3, 4  ;;  %s2257_s27 = sld [smem:[#allocation35_spill]]  ;;  %s2059_s16 = int_to_ptr.vmem [resolvable:$true] %s799_s16 }
  0xde   : > { %1152 = vmatprep.subr.bf16.mxu1 %v1652_v0  ;;  %v1157_v18 = vpack.c.bf16 %v669_v16, %v668_v15  ;;  %v576_v19 = vld [vmem:[%s410_s24] sm:$0xff]  ;;  %v670_v20 = vld [vmem:[#allocation11 + $0x10] sm:$0xff]  ;;  %v671_v21 = vld [vmem:[#allocation11 + $0x18] sm:$0xff]  ;;  %s2259_s30 = sld [smem:[#allocation36_spill]]  ;;  %s759_s24 = scalar_lea.sflag [#allocation4], %s1981_s18 }
  0xdf   : > { %v1161_v22 = vpack.c.bf16 %v671_v21, %v670_v20  ;;  %v667_v23 = vld [vmem:[%s419_s26] sm:$0xff]  ;;  %s1472_s26 = scalar_lea.vmem %s2051_s23, 128 }
  0xe0   : > { %s780_s21 = sadd.s32 %s2255_s15, %s1084_s20  ;;  %p1473_p6 = scmp.ne.s32.totalorder %s2051_s23, %s1472_s26 }
  0xe1   : > { %s2041_s7 = sshll.u32 %s780_s21, 7  ;;  %p2261_p9 = scmp.ne.s32.totalorder %s2256_s22, 0 }
  0xe2   : > { %s1655_s15 = smov [#allocation13]  }
  0xe3   : > { %s2258_s14 = smov %s2257_s27  ;;  %s2049_s10 = scalar_lea.hbm %s2257_s27, %s2041_s7 }
  0xe4   : > { %1147 = vmatpush3.bf16.xpose.msk.msra.mxu0 %vm2013_vm2, %v1145_v13  ;;  %s2260_s17 = smov %s2259_s30  ;;  %s2057_s12 = scalar_lea.hbm %s2259_s30, %s2041_s7 }
  0xe5   : > { %1156 = vmatprep.subr.bf16.mxu0 %v1652_v0  ;;  %1155 = vmatpush3.bf16.xpose.msk.msra.mxu1 %vm2013_vm2, %v1153_v14  ;;  %p1474_p5 = pnand %p1473_p6, %p2261_p9  ;;  %s1476_s20 = sshll.u32 %s1655_s15, 4  ;;  %s1477_s20 = int_to_ptr.vmem [resolvable:$false] %s1476_s20 }
  0xe6   : > { %s1478_s21 = scalar_lea.vmem %s1477_s20, 256  ;;  %p1479_p12 = scmp.lt.s32.totalorder %s2051_s23, %s1477_s20 }
  0xe7   : > { %p1475_p2 = pneg %p1474_p5  ;;  %p1480_p8 = scmp.lt.s32.totalorder %s1478_s21, %s1472_s26 }
  0xe9   : > { %p1481_p0 = por %p1480_p8, %p1479_p12 }
  0xeb   : > { %1116 = vmatmul.mubr.msk.f32.vlgmr.msra.gmra.mrb[0].mxu0 %vm489_vm1, %v484_v17  ;;  %p1482_p3 = pnand %p1481_p0, %p1475_p2 }
  0xec   : > { %1159 = vmatpush3.bf16.xpose.msk.msra.mxu0 %vm2013_vm2, %v1157_v18  ;;  %1127 = vmatmul.mubr.msk.f32.vlgmr.msra.gmra.mrb[0].mxu1 %vm489_vm1, %v576_v19 }
  0xed   : > { %1160 = vmatprep.subr.bf16.mxu0 %v1652_v0  ;;  %1137 = vmatprep.mubr.msk.f32.mxu0 %vm1653_vm0, %v1654_v1 }
  0xf4   : > { %1163 = vmatpush3.bf16.xpose.msk.msra.mxu0 %vm2013_vm2, %v1161_v22 }
  0xfb   : > { %1138 = vmatmul.mubr.msk.f32.vlgmr.msra.gmra.mrb[2].mxu0 %vm489_vm1, %v667_v23 }
 0x1be   : > { %v571_v24 = vpop.f32.mrb[0].mxu0 }
 0x1bf   : > { %575 = vst.msk [vmem:[%s469_s1] sm:$0xff] %vm489_vm1, %v571_v24  ;;  %v1117_v25 = vpop.f32.mrb[1].mxu0  ;;  %v662_v26 = vpop.f32.mrb[0].mxu1 }
 0x1c0   : > { %666 = vst.msk [vmem:[%s476_s3] sm:$0xff] %vm489_vm1, %v662_v26  ;;  %v1128_v27 = vpop.f32.mrb[1].mxu1 }
 0x1c1   : > { %1485 = shalt.err (!%p1482_p3)
}
 0x1c2   : > { %s1486_s18 = scalar_lea.hbm %s2049_s10, 128  ;;  %s1490_s11 = scalar_lea.hbm %s2258_s14, 512 }
 0x1c3   : > { %p1487_p13 = scmp.ne.s32.totalorder %s2049_s10, %s1486_s18  ;;  %p1491_p7 = scmp.lt.u32.totalorder %s2049_s10, %s2258_s14 }
 0x1c4   : > { %p1492_p1 = scmp.lt.u32.totalorder %s1490_s11, %s1486_s18  ;;  %p1494_p6 = scmp.lt.u32.totalorder %s1486_s18, %s2049_s10 }
 0x1c5   : > { %p1488_p10 = pnand %p1487_p13, %p2261_p9 }
 0x1c6   : > { %p1493_p4 = por %p1492_p1, %p1491_p7 }
 0x1c7   : > { %p1489_p11 = pneg %p1488_p10 }
 0x1c8   : > { %p1495_p5 = por %p1494_p6, %p1493_p4 }
 0x1ca   : > { %p1496_p2 = pnand %p1495_p5, %p1489_p11 }
 0x1cc   : > { %1499 = shalt.err (!%p1496_p2)
}
 0x1cd   : > { %1182 = dma.vmem_to_hbm [thread:$0]  (%p2261_p9), %s2051_s23, 128, %s2049_s10, %s759_s24  }
 0x1ce   : > { %s2087_s9 = scalar_lea.sflag [#allocation15], %s406_s8  ;;  %s1500_s25 = scalar_lea.vmem %s2059_s16, 128 }
 0x1cf   : > { %p1501_p12 = scmp.ne.s32.totalorder %s2059_s16, %s1500_s25  ;;  %s1656_s30 = smov [#allocation14]  }
 0x1d0   : > { %s1504_s26 = sshll.u32 %s1656_s30, 4  ;;  %s1505_s26 = int_to_ptr.vmem [resolvable:$false] %s1504_s26 }
 0x1d1   : > { %p1502_p8 = pnand %p1501_p12, %p2261_p9  ;;  %s1506_s15 = scalar_lea.vmem %s1505_s26, 256 }
 0x1d2   : > { %p1507_p3 = scmp.lt.s32.totalorder %s2059_s16, %s1505_s26  ;;  %p1508_p13 = scmp.lt.s32.totalorder %s1506_s15, %s1500_s25 }
 0x1d3   : > { %p1503_p0 = pneg %p1502_p8 }
 0x1d4   : > { %p1509_p10 = por %p1508_p13, %p1507_p3 }
 0x1d6   : > { %p1510_p11 = pnand %p1509_p10, %p1503_p0 }
 0x1d8   : > { %1513 = shalt.err (!%p1510_p11)
}
 0x1d9   : > { %s1514_s13 = scalar_lea.hbm %s2057_s12, 128  ;;  %s1518_s10 = scalar_lea.hbm %s2260_s17, 512 }
 0x1da   : > { %p1515_p7 = scmp.ne.s32.totalorder %s2057_s12, %s1514_s13  ;;  %p1519_p6 = scmp.lt.u32.totalorder %s2057_s12, %s2260_s17 }
 0x1db   : > { %p1520_p5 = scmp.lt.u32.totalorder %s1518_s10, %s1514_s13  ;;  %p1522_p12 = scmp.lt.u32.totalorder %s1514_s13, %s2057_s12 }
 0x1dc   : > { %p1516_p1 = pnand %p1515_p7, %p2261_p9 }
 0x1dd   : > { %p1521_p2 = por %p1520_p5, %p1519_p6 }
 0x1de   : > { %p1517_p4 = pneg %p1516_p1 }
 0x1df   : > { %p1523_p8 = por %p1522_p12, %p1521_p2 }
 0x1e1   : > { %p1524_p0 = pnand %p1523_p8, %p1517_p4 }
 0x1e3   : > { %1527 = shalt.err (!%p1524_p0)
}
 0x1e4   : > { %1183 = dma.vmem_to_hbm [thread:$0]  (%p2261_p9), %s2059_s16, 128, %s2057_s12, %s2087_s9   ;;  %v753_v28 = vpop.f32.mrb[2].mxu0 }
 0x1e5   : > { %s483_s21 = scalar_lea.vmem [#allocation16], %s1984_s6  ;;  %s2262_s11 = sld [smem:[#allocation37_spill]]  ;;  %v1139_v29 = vpop.f32.mrb[3].mxu0 }
 0x1e6   : > { %s814_s18 = sshll.u32 %s483_s21, 4  ;;  %757 = vst.msk [vmem:[%s483_s21] sm:$0xff] %vm489_vm1, %v753_v28  ;;  %s1657_s6 = smov [#allocation16]   ;;  %s2118_s18 = int_to_ptr.vmem [resolvable:$true] %s814_s18 }
 0x1e7   : > { %s1528_s25 = scalar_lea.vmem %s2118_s18, 128  ;;  %s1532_s16 = sshll.u32 %s1657_s6, 4  ;;  %s1533_s16 = int_to_ptr.vmem [resolvable:$false] %s1532_s16 }
 0x1e8   : > { %p1529_p3 = scmp.ne.s32.totalorder %s2118_s18, %s1528_s25  ;;  %s1534_s12 = scalar_lea.vmem %s1533_s16, 256 }
 0x1e9   : > { %p1535_p11 = scmp.lt.s32.totalorder %s2118_s18, %s1533_s16  ;;  %p1536_p7 = scmp.lt.s32.totalorder %s1534_s12, %s1528_s25 }
 0x1ea   : > { %p1530_p13 = pnand %p1529_p3, %p2261_p9 }
 0x1eb   : > { %s2263_s19 = smov %s2262_s11  ;;  %s2116_s27 = scalar_lea.hbm %s2262_s11, %s2041_s7 }
 0x1ec   : > { %p1531_p10 = pneg %p1530_p13  ;;  %p1537_p1 = por %p1536_p7, %p1535_p11 }
 0x1ee   : > { %p1538_p4 = pnand %p1537_p1, %p1531_p10 }
 0x1f0   : > { %1541 = shalt.err (!%p1538_p4)
}
 0x1f1   : > { %s1542_s7 = scalar_lea.hbm %s2116_s27, 128  ;;  %s1546_s15 = scalar_lea.hbm %s2263_s19, 512 }
 0x1f2   : > { %p1543_p6 = scmp.ne.s32.totalorder %s2116_s27, %s1542_s7  ;;  %p1547_p12 = scmp.lt.u32.totalorder %s2116_s27, %s2263_s19 }
 0x1f3   : > { %p1548_p8 = scmp.lt.u32.totalorder %s1546_s15, %s1542_s7  ;;  %p1550_p3 = scmp.lt.u32.totalorder %s1542_s7, %s2116_s27 }
 0x1f4   : > { %p1544_p5 = pnand %p1543_p6, %p2261_p9 }
 0x1f5   : > { %p1549_p0 = por %p1548_p8, %p1547_p12 }
 0x1f6   : > { %p1545_p2 = pneg %p1544_p5 }
 0x1f7   : > { %p1551_p13 = por %p1550_p3, %p1549_p0 }
 0x1f9   : > { %p1552_p10 = pnand %p1551_p13, %p1545_p2 }
 0x1fb   : > { %1555 = shalt.err (!%p1552_p10)
}
 0x1fc   : > { %1184 = dma.vmem_to_hbm [thread:$0]  (%p2261_p9), %s2118_s18, 128, %s2116_s27, %s2087_s9  }
 0x1fd PF: > { %s2264_s23 = sld [smem:[#allocation27_spill]]  ;;  %s2265_s10 = sld [smem:[#allocation23_spill]] }
 0x1fe   : > { %s2266_s24 = sld [smem:[#allocation28_spill]] }
 0x203   : > { %p1225_p11 = scmp.ge.s32.totalorder %s2264_s23, 2  ;;  %s826_s20 = sand.u32 1, %s2265_s10  }
 0x204   : > { %p2267_p7 = scmp.ne.s32.totalorder %s2266_s24, 0  ;;  %s827_s21 = scalar_lea.sflag [#allocation4], %s826_s20 }
 0x206   : > { %p1209_p1 = pnand %p1225_p11, %p2267_p7 }
 0x208   : > { %1605 = dma.done.wait (!%p1209_p1), %s827_s21, 128  }
 0x209   : > { %1607 = vsyncadd (!%p1209_p1), %s827_s21, 4294967168  ;;  %s2268_s1 = sadd.s32 4294967294, %s2264_s23  }
 0x20a   : > { %s835_s3 = sand.u32 1, %s2268_s1  }
 0x20b   : > { %s836_s11 = scalar_lea.sflag [#allocation15], %s835_s3 }
 0x20c   : > { %1609 = dma.done.wait (!%p1209_p1), %s836_s11, 256  }
 0x20d   : > { %1611 = vsyncadd (!%p1209_p1), %s836_s11, 4294967040  ;;  %s33_s12 = sadd.s32 1, %s2264_s23   ;;  %s2269_s22 = sld [smem:[#allocation32_spill]] }
 0x20e   : > { %p30_p9 = scmp.ge.s32.totalorder %s33_s12, 6   ;;  %s2270_s30 = sld [smem:[#allocation25_spill]] }
 0x20f   : > { %s2271_s9 = sld [smem:[#allocation26_spill]]  ;;  %s2272_s10 = sld [smem:[#allocation29_spill]] }
 0x210   : > { %s2273_s11 = sld [smem:[#allocation31_spill]]  ;;  %s2274_s27 = smov %s1618_s28 }
 0x211   : > { %s2275_s28 = smov %s1622_s29  ;;  %32 = sbr.rel (!%p30_p9) target bundleno = 19 (0x13), region = 157 }
 0x213   : > { %s2276_s29 = smov %s2269_s22 }
 0x218   :  { %850 = vsyncpa [#allocation3], 1 }
 0x219   :  { %852 = vsyncpa [#allocation3 + $0x1], 1 }
 0x21a   :  { %853 = vsyncpa [#allocation6], 1 }
 0x21b   :  { %855 = vsyncpa [#allocation6 + $0x1], 1 }
 0x21c   :  { %856 = vsyncpa [#allocation9], 1 }
 0x21d   :  { %857 = vsyncpa [#allocation12], 1 }
 0x21e   :  { %858 = vsyncpa [#allocation4], 1 }
 0x21f   :  { %860 = vsyncpa [#allocation4 + $0x1], 1 }
 0x220   :  { %861 = vsyncpa [#allocation15], 1 }
 0x221   :  { %863 = vsyncpa [#allocation15 + $0x1], 1 }

// kernel: tpu_custom_call.1
= control target key start
LH: loop header
LB: loop body
LE: loop exit
PB: predicated region body
PF: predicated region fallthrough
CT: control target
= control target key end

     0   :  { %s2173_s0 = inlined_call_operand.hbm [shape: f32[2,16,32], index: 0, kind: input, shape index: {}]   ;;  %s2174_s1 = inlined_call_operand.hbm [shape: f32[2,16,32], index: 1, kind: input, shape index: {}]   ;;  %s2175_s2 = inlined_call_operand.hbm [shape: f32[2,16,32], index: 2, kind: input, shape index: {}]   ;;  %s2176_s3 = inlined_call_operand.hbm [shape: f32[32,32], index: 3, kind: input, shape index: {}]   ;;  %s2177_s4 = inlined_call_operand.hbm [shape: f32[32,32], index: 4, kind: input, shape index: {}]   ;;  %s2178_s5 = inlined_call_operand.hbm [shape: f32[32,32], index: 5, kind: input, shape index: {}]   ;;  %s2179_s6 = inlined_call_operand.hbm [shape: f32[2,16,32], index: 6, kind: output, shape index: {0}]   ;;  %s2180_s7 = inlined_call_operand.hbm [shape: f32[2,16,32], index: 7, kind: output, shape index: {1}]   ;;  %s2181_s8 = inlined_call_operand.hbm [shape: f32[2,16,32], index: 8, kind: output, shape index: {2}]  }
   0x1   :  { %2213 = sst [smem:[#allocation33_spill]] %s2174_s1 }
   0x2   :  { %2214 = sst [smem:[#allocation34_spill]] %s2176_s3 }
   0x3   :  { %2215 = sst [smem:[#allocation35_spill]] %s2179_s6 }
   0x4   :  { %2216 = sst [smem:[#allocation36_spill]] %s2180_s7 }
   0x5   :  { %2217 = sst [smem:[#allocation37_spill]] %s2181_s8 }
   0x6   :  { %14 = vsyncpa [#allocation3], 0 }
   0x7   :  { %16 = vsyncpa [#allocation3 + $0x1], 0 }
   0x8   :  { %17 = vsyncpa [#allocation6], 0 }
   0x9   :  { %19 = vsyncpa [#allocation6 + $0x1], 0 }
   0xa   :  { %20 = vsyncpa [#allocation9], 0 }
   0xb   :  { %21 = vsyncpa [#allocation12], 0 }
   0xc   :  { %22 = vsyncpa [#allocation4], 0 }
   0xd   :  { %24 = vsyncpa [#allocation4 + $0x1], 0 }
   0xe   :  { %25 = vsyncpa [#allocation15], 0 }
   0xf   :  { %27 = vsyncpa [#allocation15 + $0x1], 0  ;;  %s1703_s27 = smov 0   ;;  %s1705_s28 = smov 0  }
  0x10   :  { %s1707_s29 = smov 0   ;;  %s1709_s30 = smov 0  }
  0x11   :  { %s1711_s9 = smov 0   ;;  %s1713_s10 = smov 0  }
  0x12   :  { %s1715_s11 = smov 0   ;;  %s1717_s12 = smov 0  }
  0x13 LB: > { %2218 = sst [smem:[#allocation23_spill]] %s1614_s27  ;;  %s1744_s13 = sadd.s32 4294967295, %s1642_s12   ;;  %s1642_s12 = sphi %s1717_s12, %s33_s12   ;;  %s1638_s11 = sphi %s1715_s11, %s2273_s11   ;;  %s1634_s10 = sphi %s1713_s10, %s2272_s10   ;;  %s1630_s9 = sphi %s1711_s9, %s2271_s9   ;;  %s1626_s30 = sphi %s1709_s30, %s2270_s30   ;;  %s1622_s29 = sphi %s1707_s29, %s2276_s29   ;;  %s1618_s28 = sphi %s1705_s28, %s2275_s28   ;;  %s1614_s27 = sphi %s1703_s27, %s2274_s27  }
  0x14   : > { %2219 = sst [smem:[#allocation24_spill]] %s1626_s30  ;;  %s2182_s14 = sadd.s32 4294967294, %s1642_s12  }
  0x15   : > { %2220 = sst [smem:[#allocation25_spill]] %s1634_s10  ;;  %p67_p0 = scmp.ne.s32.totalorder %s1618_s28, %s1614_s27 }
  0x16   : > { %2221 = sst [smem:[#allocation26_spill]] %s1638_s11  ;;  %p2183_p1 = scmp.eq.s32.totalorder %s1744_s13, 0 }
  0x17   : > { %2222 = sst [smem:[#allocation27_spill]] %s1642_s12  ;;  %p218_p3 = scmp.eq.s32.totalorder %s2182_s14, 3 }
  0x18   : > { %p1755_p4 = por %p2183_p1, %p67_p0  ;;  %p1042_p5 = scmp.ge.s32.totalorder %s1642_s12, 1 }
  0x19   : > { %p1760_p6 = por %p218_p3, %p67_p0  ;;  %p281_p7 = scmp.lt.s32.totalorder %s1642_s12, 5 }
  0x1a   : > { %s2223_s15 = scalar_select %p1755_p4, 1, 0 }
  0x1b   : > { %s2224_s16 = scalar_select %p1760_p6, 1, 0 }
  0x1c   : > { %p1765_p8 = pnand %p1042_p5, %p281_p7  ;;  %s1644_s18 = smov [#allocation8]  }
  0x1d   : > { %2225 = sst [smem:[#allocation28_spill]] %s2224_s16  ;;  %s293_s19 = sshll.u32 %s1644_s18, 4  ;;  %s294_s19 = int_to_ptr.vmem [resolvable:$true] %s293_s19 }
  0x1e   : > { %s2226_s17 = scalar_select %p1765_p8, 1, 0 }
  0x1f   : > { %p1188_p9 = pneg %p1765_p8  ;;  %s2228_s3 = sld [smem:[#allocation34_spill]] }
  0x21   : > { %p1773_p10 = pnand %p1188_p9, %p2183_p1 }
  0x23   : > { %s2227_s20 = scalar_select %p1773_p10, 1, 0 }
  0x24   : > { %p1785_p12 = pneg %p1773_p10 }
  0x25   : > { %s1298_s23 = scalar_lea.hbm %s2228_s3, 512 }
  0x26   : > { %p1299_p11 = scmp.ne.s32.totalorder %s2228_s3, %s1298_s23  ;;  %p1305_p3 = scmp.lt.u32.totalorder %s1298_s23, %s2228_s3 }
  0x27   : > { %s2229_s26 = scalar_select %p1785_p12, 1, 0 }
  0x28   : > { %p1301_p13 = pnand %p1785_p12, %p1299_p11 }
  0x2a   : > { %p1302_p0 = pneg %p1301_p13 }
  0x2c   : > { %p1307_p5 = pnand %p1305_p3, %p1302_p0 }
  0x2e   : > { %1310 = shalt.err (!%p1307_p5)
}
  0x2f   : > { %s1311_s21 = scalar_lea.vmem %s294_s19, 512  ;;  %p1319_p2 = scmp.lt.s32.totalorder %s294_s19, %s294_s19 }
  0x30   : > { %p1312_p7 = scmp.ne.s32.totalorder %s294_s19, %s1311_s21  ;;  %p1320_p6 = scmp.lt.s32.totalorder %s1311_s21, %s1311_s21 }
  0x32   : > { %p1314_p9 = pnand %p1312_p7, %p1785_p12  ;;  %p1321_p4 = por %p1320_p6, %p1319_p2 }
  0x34   : > { %p1315_p1 = pneg %p1314_p9 }
  0x36   : > { %p1322_p8 = pnand %p1321_p4, %p1315_p1 }
  0x38   : > { %1325 = shalt.err (!%p1322_p8)
}
  0x39   : > { %s2187_s22 = smov 128   ;;  %s2189_s14 = smov 8  }
  0x3a   : > { %1191 = dma.hbm_to_vmem [thread:$0]  (!%p1773_p10), %s2228_s3, 512, %s294_s19, [#allocation9], %s2187_s22, %s2187_s22, %s2189_s14  }
  0x3b   : > { %s42_s25 = sadd.s32 1, %s1634_s10  ;;  %s45_s18 = sadd.s32 1, %s1638_s11 }
  0x3c   : > { %p43_p1 = scmp.ge.s32.totalorder %s42_s25, 2  ;;  %s54_s21 = sadd.s32 1, %s1622_s29 }
  0x3d   : > { %p61_p2 = scmp.ne.s32.totalorder %s1622_s29, %s1618_s28  ;;  %p62_p4 = scmp.eq.s32.totalorder %s1642_s12, 0 }
  0x3e   : > { %s2278_s25 = smov (%p43_p1, %s42_s25), 0  ;;  %s2280_s18 = smov (!%p43_p1, %s45_s18), %s1638_s11 }
  0x3f   : > { %2230 = sst [smem:[#allocation29_spill]] %s2278_s25  ;;  %s50_s16 = ssub.s32 %s1634_s10, %s2278_s25 }
  0x40   : > { %p47_p6 = scmp.ge.s32.totalorder %s2280_s18, 2  ;;  %p2231_p8 = scmp.eq.s32.totalorder %s1744_s13, 3 }
  0x41   : > { %p63_p13 = por %p62_p4, %p61_p2  ;;  %p1221_p0 = scmp.lt.s32.totalorder %s1642_s12, 4 }
  0x42   : > { %p1817_p11 = por %p2231_p8, %p61_p2  ;;  %s2282_s18 = smov (%p47_p6, %s2280_s18), 0 }
  0x43   : > { %2234 = sst [smem:[#allocation31_spill]] %s2282_s18  ;;  %s2199_s23 = sand.u32 1, %s1622_s29  }
  0x44   : > { %s2232_s19 = scalar_select %p1817_p11, 1, 0 }
  0x45   : > { %s1048_s24 = sshll.u32 %s1638_s11, 1  ;;  %s49_s22 = ssub.s32 %s1638_s11, %s2282_s18 }
  0x46   : > { %2233 = sst [smem:[#allocation30_spill]] %s2232_s19  ;;  %s1830_s14 = sshll.u32 %s2199_s23, 3 }
  0x47   : > { %s51_s3 = sor.u32 %s50_s16, %s49_s22  ;;  %s342_s25 = sadd.s32 %s1634_s10, %s1048_s24 }
  0x48   : > { %p52_p3 = scmp.eq.s32.totalorder %s51_s3, 0  ;;  %s1833_s27 = sshll.u32 %s342_s25, 7 }
  0x49   : > { %p1835_p5 = pnand %p1221_p0, %p63_p13  ;;  %s353_s7 = sand.u32 1, %s1642_s12  }
  0x4a   : > { %s1841_s6 = scalar_select %p52_p3, %s1622_s29, %s54_s21  }
  0x4b   : > { %s2235_s8 = scalar_select %p1835_p5, 1, 0 }
  0x4c   : > { %2236 = sst [smem:[#allocation32_spill]] %s1841_s6  ;;  %s2237_s1 = sld [smem:[#allocation33_spill]] }
  0x4d   : > { %s357_s3 = scalar_lea.vmem [#allocation5], %s1830_s14  ;;  %s1647_s22 = smov [#allocation10]  }
  0x4e   : > { %s366_s16 = sshll.u32 %s357_s3, 4  ;;  %s1852_s25 = sshll.u32 %s1647_s22, 4  ;;  %s1850_s16 = int_to_ptr.vmem [resolvable:$true] %s366_s16  ;;  %s307_s25 = int_to_ptr.vmem [resolvable:$true] %s1852_s25 }
  0x4f   : > { %s1854_s24 = scalar_lea.sflag [#allocation6], %s353_s7  ;;  %p1860_p9 = pneg %p1835_p5 }
  0x51   : > { %s2238_s18 = scalar_select %p1860_p9, 1, 0 }
  0x52   : > { %s1847_s23 = scalar_lea.hbm %s2237_s1, %s1833_s27  ;;  %s1331_s11 = scalar_lea.hbm %s2237_s1, 512 }
  0x53   : > { %s1326_s21 = scalar_lea.hbm %s1847_s23, 128  ;;  %p1332_p4 = scmp.lt.u32.totalorder %s1847_s23, %s2237_s1 }
  0x54   : > { %p1327_p7 = scmp.ne.s32.totalorder %s1847_s23, %s1326_s21  ;;  %p1333_p6 = scmp.lt.u32.totalorder %s1331_s11, %s1326_s21 }
  0x55   : > { %p1335_p13 = scmp.lt.u32.totalorder %s1326_s21, %s1847_s23 }
  0x56   : > { %p1329_p1 = pnand %p1860_p9, %p1327_p7  ;;  %p1334_p8 = por %p1333_p6, %p1332_p4 }
  0x58   : > { %p1330_p2 = pneg %p1329_p1  ;;  %p1336_p0 = por %p1335_p13, %p1334_p8 }
  0x5a   : > { %p1337_p3 = pnand %p1336_p0, %p1330_p2 }
  0x5c   : > { %1340 = shalt.err (!%p1337_p3)
}
  0x5d   : > { %s1341_s7 = scalar_lea.vmem %s1850_s16, 128  ;;  %s1648_s19 = smov [#allocation5]  }
  0x5e   : > { %p1342_p7 = scmp.ne.s32.totalorder %s1850_s16, %s1341_s7  ;;  %s1346_s3 = sshll.u32 %s1648_s19, 4  ;;  %s1347_s3 = int_to_ptr.vmem [resolvable:$false] %s1346_s3 }
  0x5f   : > { %s1348_s10 = scalar_lea.vmem %s1347_s3, 256  ;;  %p1349_p10 = scmp.lt.s32.totalorder %s1850_s16, %s1347_s3 }
  0x60   : > { %p1344_p1 = pnand %p1342_p7, %p1860_p9  ;;  %p1350_p12 = scmp.lt.s32.totalorder %s1348_s10, %s1341_s7 }
  0x62   : > { %p1345_p11 = pneg %p1344_p1  ;;  %p1351_p4 = por %p1350_p12, %p1349_p10 }
  0x64   : > { %p1352_p6 = pnand %p1351_p4, %p1345_p11 }
  0x66   : > { %1355 = shalt.err (!%p1352_p6)
}
  0x67   : > { %1204 = dma.hbm_to_vmem [thread:$0]  (!%p1835_p5), %s1847_s23, 128, %s1850_s16, %s1854_s24  }
  0x68   : > { %s1356_s22 = scalar_lea.hbm %s2177_s4, 512  ;;  %p2239_p10 = scmp.ne.s32.totalorder %s2229_s26, 0 }
  0x69   : > { %p1357_p2 = scmp.ne.s32.totalorder %s2177_s4, %s1356_s22  ;;  %p1363_p8 = scmp.lt.u32.totalorder %s1356_s22, %s2177_s4 }
  0x6b   : > { %p1359_p12 = pnand %p1357_p2, %p2239_p10 }
  0x6d   : > { %p1360_p11 = pneg %p1359_p12 }
  0x6f   : > { %p1365_p13 = pnand %p1363_p8, %p1360_p11 }
  0x71   : > { %1368 = shalt.err (!%p1365_p13)
}
  0x72   : > { %s1369_s10 = scalar_lea.vmem %s307_s25, 512  ;;  %p1377_p1 = scmp.lt.s32.totalorder %s307_s25, %s307_s25 }
  0x73   : > { %p1370_p0 = scmp.ne.s32.totalorder %s307_s25, %s1369_s10  ;;  %p1378_p4 = scmp.lt.s32.totalorder %s1369_s10, %s1369_s10 }
  0x75   : > { %p1372_p3 = pnand %p1370_p0, %p2239_p10  ;;  %p1379_p6 = por %p1378_p4, %p1377_p1 }
  0x77   : > { %p1373_p7 = pneg %p1372_p3 }
  0x79   : > { %p1380_p5 = pnand %p1379_p6, %p1373_p7 }
  0x7b   : > { %1383 = shalt.err (!%p1380_p5)
}
  0x7c   : > { %p2240_p2 = scmp.ne.s32.totalorder %s2227_s20, 0  ;;  %s2241_s1 = smov 8  }
  0x7d   : > { %s2242_s23 = smov 128   ;;  %s1649_s21 = smov [#allocation11]  }
  0x7e   : > { %1194 = dma.hbm_to_vmem [thread:$0]  (!%p2240_p2), %s2177_s4, 512, %s307_s25, [#allocation9], %s2242_s23, %s2242_s23, %s2241_s1  }
  0x7f   : > { %s319_s22 = sshll.u32 %s1649_s21, 4  ;;  %s1384_s3 = scalar_lea.hbm %s2178_s5, 512  ;;  %s320_s22 = int_to_ptr.vmem [resolvable:$true] %s319_s22 }
  0x80   : > { %p1385_p5 = scmp.ne.s32.totalorder %s2178_s5, %s1384_s3  ;;  %p1391_p8 = scmp.lt.u32.totalorder %s1384_s3, %s2178_s5 }
  0x82   : > { %p1387_p12 = pnand %p1385_p5, %p2239_p10 }
  0x84   : > { %p1388_p11 = pneg %p1387_p12 }
  0x86   : > { %p1393_p13 = pnand %p1391_p8, %p1388_p11 }
  0x88   : > { %1396 = shalt.err (!%p1393_p13)
}
  0x89   : > { %s1397_s25 = scalar_lea.vmem %s320_s22, 512  ;;  %p1405_p1 = scmp.lt.s32.totalorder %s320_s22, %s320_s22 }
  0x8a   : > { %p1398_p0 = scmp.ne.s32.totalorder %s320_s22, %s1397_s25  ;;  %p1406_p4 = scmp.lt.s32.totalorder %s1397_s25, %s1397_s25 }
  0x8c   : > { %p1400_p3 = pnand %p1398_p0, %p2239_p10  ;;  %p1407_p6 = por %p1406_p4, %p1405_p1 }
  0x8e   : > { %p1401_p7 = pneg %p1400_p3 }
  0x90   : > { %p1408_p9 = pnand %p1407_p6, %p1401_p7 }
  0x92   : > { %1411 = shalt.err (!%p1408_p9)
}
  0x93   : > { %1197 = dma.hbm_to_vmem [thread:$0]  (!%p2240_p2), %s2178_s5, 512, %s320_s22, [#allocation12], %s2242_s23, %s2242_s23, %s2241_s1  }
  0x94   : > { %s1931_s16 = scalar_lea.hbm %s2173_s0, %s1833_s27  ;;  %s337_s20 = scalar_lea.vmem [#allocation2], %s1830_s14 }
  0x95   : > { %s346_s11 = sshll.u32 %s337_s20, 4  ;;  %s2243_s21 = sand.u32 1, %s1622_s29   ;;  %s347_s11 = int_to_ptr.vmem [resolvable:$true] %s346_s11 }
  0x96   : > { %s334_s19 = scalar_lea.sflag [#allocation3], %s2243_s21  ;;  %s1412_s7 = scalar_lea.hbm %s1931_s16, 128 }
  0x97   : > { %p1413_p9 = scmp.ne.s32.totalorder %s1931_s16, %s1412_s7  ;;  %p2244_p10 = scmp.ne.s32.totalorder %s2238_s18, 0 }
  0x98   : > { %s1417_s22 = scalar_lea.hbm %s2173_s0, 512  ;;  %p1418_p2 = scmp.lt.u32.totalorder %s1931_s16, %s2173_s0 }
  0x99   : > { %p1415_p5 = pnand %p1413_p9, %p2244_p10  ;;  %p1419_p11 = scmp.lt.u32.totalorder %s1417_s22, %s1412_s7 }
  0x9a   : > { %p1421_p13 = scmp.lt.u32.totalorder %s1412_s7, %s1931_s16 }
  0x9b   : > { %p1416_p12 = pneg %p1415_p5  ;;  %p1420_p8 = por %p1419_p11, %p1418_p2 }
  0x9d   : > { %p1422_p0 = por %p1421_p13, %p1420_p8 }
  0x9f   : > { %p1423_p3 = pnand %p1422_p0, %p1416_p12 }
  0xa1   : > { %1426 = shalt.err (!%p1423_p3)
}
  0xa2   : > { %s1427_s25 = scalar_lea.vmem %s347_s11, 128  ;;  %s1650_s6 = smov [#allocation2]  }
  0xa3   : > { %p1428_p7 = scmp.ne.s32.totalorder %s347_s11, %s1427_s25  ;;  %s1432_s30 = sshll.u32 %s1650_s6, 4  ;;  %s1433_s30 = int_to_ptr.vmem [resolvable:$false] %s1432_s30 }
  0xa4   : > { %s1434_s12 = scalar_lea.vmem %s1433_s30, 256  ;;  %p1435_p6 = scmp.lt.s32.totalorder %s347_s11, %s1433_s30 }
  0xa5   : > { %p1430_p1 = pnand %p1428_p7, %p2244_p10  ;;  %p1436_p9 = scmp.lt.s32.totalorder %s1434_s12, %s1427_s25 }
  0xa7   : > { %p1431_p4 = pneg %p1430_p1  ;;  %p1437_p5 = por %p1436_p9, %p1435_p6 }
  0xa9   : > { %p1438_p2 = pnand %p1437_p5, %p1431_p4 }
  0xab   : > { %1441 = shalt.err (!%p1438_p2)
}
  0xac   : > { %p2245_p11 = scmp.ne.s32.totalorder %s2235_s8, 0  ;;  %s1957_s21 = scalar_lea.hbm %s2175_s2, %s1833_s27 }
  0xad   : > { %s377_s7 = scalar_lea.vmem [#allocation7], %s1830_s14  ;;  %s1442_s23 = scalar_lea.hbm %s1957_s21, 128 }
  0xae   : > { %1201 = dma.hbm_to_vmem [thread:$0]  (!%p2245_p11), %s1931_s16, 128, %s347_s11, %s334_s19  }
  0xaf   : > { %s386_s1 = sshll.u32 %s377_s7, 4  ;;  %p1443_p12 = scmp.ne.s32.totalorder %s1957_s21, %s1442_s23  ;;  %s387_s1 = int_to_ptr.vmem [resolvable:$true] %s386_s1 }
  0xb0   : > { %s1447_s16 = scalar_lea.hbm %s2175_s2, 512  ;;  %p1448_p0 = scmp.lt.u32.totalorder %s1957_s21, %s2175_s2 }
  0xb1   : > { %p1445_p8 = pnand %p1443_p12, %p2244_p10  ;;  %p1449_p3 = scmp.lt.u32.totalorder %s1447_s16, %s1442_s23 }
  0xb2   : > { %p1451_p1 = scmp.lt.u32.totalorder %s1442_s23, %s1957_s21 }
  0xb3   : > { %p1446_p13 = pneg %p1445_p8  ;;  %p1450_p7 = por %p1449_p3, %p1448_p0 }
  0xb5   : > { %p1452_p4 = por %p1451_p1, %p1450_p7 }
  0xb7   : > { %p1453_p6 = pnand %p1452_p4, %p1446_p13 }
  0xb9   : > { %1456 = shalt.err (!%p1453_p6)
}
  0xba   : > { %s1457_s27 = scalar_lea.vmem %s387_s1, 128  ;;  %s1651_s14 = smov [#allocation7]  }
  0xbb   : > { %p1458_p9 = scmp.ne.s32.totalorder %s387_s1, %s1457_s27  ;;  %s1462_s10 = sshll.u32 %s1651_s14, 4  ;;  %s1463_s10 = int_to_ptr.vmem [resolvable:$false] %s1462_s10 }
  0xbc   : > { %s1464_s25 = scalar_lea.vmem %s1463_s10, 256  ;;  %p1465_p12 = scmp.lt.s32.totalorder %s387_s1, %s1463_s10 }
  0xbd   : > { %p1460_p5 = pnand %p1458_p9, %p2244_p10  ;;  %p1466_p8 = scmp.lt.s32.totalorder %s1464_s25, %s1457_s27 }
  0xbf   : > { %p1461_p2 = pneg %p1460_p5  ;;  %p1467_p11 = por %p1466_p8, %p1465_p12 }
  0xc1   : > { %p1468_p0 = pnand %p1467_p11, %p1461_p2 }
  0xc3   : > { %1471 = shalt.err (!%p1468_p0)
}
  0xc4   : > { %p2246_p3 = scmp.ne.s32.totalorder %s2235_s8, 0  ;;  %p2247_p13 = scmp.ne.s32.totalorder %s2226_s17, 0 }
  0xc5   : > { %s1981_s18 = sand.u32 (!%p2247_p13), 1, %s1618_s28   ;;  %p2248_p10 = scmp.ne.s32.totalorder (!%p2247_p13), %s2223_s15, 0 }
  0xc6   : > { %1207 = dma.hbm_to_vmem [thread:$0]  (!%p2246_p3), %s1957_s21, 128, %s387_s1, %s1854_s24  }
  0xc7   : > { %395 = sbr.rel (%p2247_p13) target bundleno = 509 (0x1fd), region = 44  ;;  %s1984_s6 = sshll.u32 (!%p2247_p13), %s1981_s18, 3 }
  0xc8   : > { %s398_s30 = scalar_lea.sflag (!%p2247_p13), [#allocation3], %s1981_s18  ;;  %s401_s12 = scalar_lea.vmem (!%p2247_p13), [#allocation2], %s1984_s6 }
  0xce   : > { %1589 = dma.done.wait (%p2248_p10), %s398_s30, 128  }
  0xcf   : > { %1591 = vsyncadd (%p2248_p10), %s398_s30, 4294967168  ;;  %s406_s8 = sand.u32 1, %s1744_s13   ;;  %s410_s24 = scalar_lea.vmem [#allocation5], %s1984_s6 }
  0xd0   : > { %s407_s17 = scalar_lea.sflag [#allocation6], %s406_s8 }
  0xd1   : > { %1593 = dma.done.wait (%p2248_p10), %s407_s17, 256  }
  0xd2   : > { %1595 = vsyncadd (%p2248_p10), %s407_s17, 4294967040  ;;  %s419_s26 = scalar_lea.vmem [#allocation7], %s1984_s6  ;;  %p2249_p11 = scmp.eq.s32.totalorder %s1744_s13, 0 }
  0xd4   : > { %1597 = dma.done.wait (%p2249_p11), [#allocation9], 1024   ;;  %p2250_p7 = pmov %p2249_p11 }
  0xd6   : > { %1599 = vsyncadd (%p2250_p7), [#allocation9], 4294966272  ;;  %p2251_p1 = pmov %p2250_p7 }
  0xd8   : > { %1601 = dma.done.wait (%p2251_p1), [#allocation12], 512   ;;  %p2252_p4 = pmov %p2251_p1 }
  0xd9   : > { %v1652_v0 = vmov 0.0|0.0   ;;  %vm1653_vm0 = vmmov 0   ;;  %v1654_v1 = vmov 0.0   ;;  %vm489_vm1 = vcmask 261120   ;;  %v485_v2 = vld [vmem:[#allocation8] sm:$0xff]  ;;  %v486_v3 = vld [vmem:[#allocation8 + $0x8] sm:$0xff] }
  0xda   : > { %1603 = vsyncadd (%p2252_p4), [#allocation12], 4294966784  ;;  %1140 = vmatprep.subr.bf16.mxu0 %v1652_v0  ;;  %1148 = vmatprep.subr.bf16.mxu1 %v1652_v0  ;;  %v1141_v5 = vpack.c.bf16 %v486_v3, %v485_v2  ;;  %v577_v6 = vld [vmem:[#allocation10] sm:$0xff]  ;;  %v578_v7 = vld [vmem:[#allocation10 + $0x8] sm:$0xff]  ;;  %s2255_s15 = sld [smem:[#allocation24_spill]]  ;;  %s1084_s20 = sshll.u32 %s1630_s9, 1 }
  0xdb   : > { %1115 = vmatprep.mubr.msk.f32.mxu0 %vm1653_vm0, %v1654_v1  ;;  %1126 = vmatprep.mubr.msk.f32.mxu1 %vm1653_vm0, %v1654_v1  ;;  %vm2013_vm2 = vmpackc.low %vm489_vm1, %vm489_vm1  ;;  %v1149_v8 = vpack.c.bf16 %v578_v7, %v577_v6  ;;  %v487_v9 = vld [vmem:[#allocation8 + $0x10] sm:$0xff]  ;;  %v488_v10 = vld [vmem:[#allocation8 + $0x18] sm:$0xff]  ;;  %s469_s1 = scalar_lea.vmem [#allocation13], %s1984_s6  ;;  %s2256_s22 = sld [smem:[#allocation30_spill]] }
  0xdc   : > { %1143 = vmatpush3.bf16.xpose.msk.msra.mxu0 %vm2013_vm2, %v1141_v5  ;;  %v579_v11 = vld [vmem:[#allocation10 + $0x10] sm:$0xff]  ;;  %v580_v12 = vld [vmem:[#allocation10 + $0x18] sm:$0xff]  ;;  %v1145_v13 = vpack.c.bf16 %v488_v10, %v487_v9  ;;  %v668_v15 = vld [vmem:[#allocation11] sm:$0xff]  ;;  %s784_s23 = sshll.u32 %s469_s1, 4  ;;  %s476_s3 = scalar_lea.vmem [#allocation14], %s1984_s6  ;;  %s2051_s23 = int_to_ptr.vmem [resolvable:$true] %s784_s23 }
  0xdd   : > { %1144 = vmatprep.subr.bf16.mxu0 %v1652_v0  ;;  %1151 = vmatpush3.bf16.xpose.msk.msra.mxu1 %vm2013_vm2, %v1149_v8  ;;  %v1153_v14 = vpack.c.bf16 %v580_v12, %v579_v11  ;;  %v669_v16 = vld [vmem:[#allocation11 + $0x8] sm:$0xff]  ;;  %v484_v17 = vld [vmem:[%s401_s12] sm:$0xff]  ;;  %s799_s16 = sshll.u32 %s476_s3, 4  ;;  %s2257_s27 = sld [smem:[#allocation35_spill]]  ;;  %s2059_s16 = int_to_ptr.vmem [resolvable:$true] %s799_s16 }
  0xde   : > { %1152 = vmatprep.subr.bf16.mxu1 %v1652_v0  ;;  %v1157_v18 = vpack.c.bf16 %v669_v16, %v668_v15  ;;  %v576_v19 = vld [vmem:[%s410_s24] sm:$0xff]  ;;  %v670_v20 = vld [vmem:[#allocation11 + $0x10] sm:$0xff]  ;;  %v671_v21 = vld [vmem:[#allocation11 + $0x18] sm:$0xff]  ;;  %s2259_s30 = sld [smem:[#allocation36_spill]]  ;;  %s759_s24 = scalar_lea.sflag [#allocation4], %s1981_s18 }
  0xdf   : > { %v1161_v22 = vpack.c.bf16 %v671_v21, %v670_v20  ;;  %v667_v23 = vld [vmem:[%s419_s26] sm:$0xff]  ;;  %s1472_s26 = scalar_lea.vmem %s2051_s23, 128 }
  0xe0   : > { %s780_s21 = sadd.s32 %s2255_s15, %s1084_s20  ;;  %p1473_p6 = scmp.ne.s32.totalorder %s2051_s23, %s1472_s26 }
  0xe1   : > { %s2041_s7 = sshll.u32 %s780_s21, 7  ;;  %p2261_p9 = scmp.ne.s32.totalorder %s2256_s22, 0 }
  0xe2   : > { %s1655_s15 = smov [#allocation13]  }
  0xe3   : > { %s2258_s14 = smov %s2257_s27  ;;  %s2049_s10 = scalar_lea.hbm %s2257_s27, %s2041_s7 }
  0xe4   : > { %1147 = vmatpush3.bf16.xpose.msk.msra.mxu0 %vm2013_vm2, %v1145_v13  ;;  %s2260_s17 = smov %s2259_s30  ;;  %s2057_s12 = scalar_lea.hbm %s2259_s30, %s2041_s7 }
  0xe5   : > { %1156 = vmatprep.subr.bf16.mxu0 %v1652_v0  ;;  %1155 = vmatpush3.bf16.xpose.msk.msra.mxu1 %vm2013_vm2, %v1153_v14  ;;  %p1474_p5 = pnand %p1473_p6, %p2261_p9  ;;  %s1476_s20 = sshll.u32 %s1655_s15, 4  ;;  %s1477_s20 = int_to_ptr.vmem [resolvable:$false] %s1476_s20 }
  0xe6   : > { %s1478_s21 = scalar_lea.vmem %s1477_s20, 256  ;;  %p1479_p12 = scmp.lt.s32.totalorder %s2051_s23, %s1477_s20 }
  0xe7   : > { %p1475_p2 = pneg %p1474_p5  ;;  %p1480_p8 = scmp.lt.s32.totalorder %s1478_s21, %s1472_s26 }
  0xe9   : > { %p1481_p0 = por %p1480_p8, %p1479_p12 }
  0xeb   : > { %1116 = vmatmul.mubr.msk.f32.vlgmr.msra.gmra.mrb[0].mxu0 %vm489_vm1, %v484_v17  ;;  %p1482_p3 = pnand %p1481_p0, %p1475_p2 }
  0xec   : > { %1159 = vmatpush3.bf16.xpose.msk.msra.mxu0 %vm2013_vm2, %v1157_v18  ;;  %1127 = vmatmul.mubr.msk.f32.vlgmr.msra.gmra.mrb[0].mxu1 %vm489_vm1, %v576_v19 }
  0xed   : > { %1160 = vmatprep.subr.bf16.mxu0 %v1652_v0  ;;  %1137 = vmatprep.mubr.msk.f32.mxu0 %vm1653_vm0, %v1654_v1 }
  0xf4   : > { %1163 = vmatpush3.bf16.xpose.msk.msra.mxu0 %vm2013_vm2, %v1161_v22 }
  0xfb   : > { %1138 = vmatmul.mubr.msk.f32.vlgmr.msra.gmra.mrb[2].mxu0 %vm489_vm1, %v667_v23 }
 0x1be   : > { %v571_v24 = vpop.f32.mrb[0].mxu0 }
 0x1bf   : > { %575 = vst.msk [vmem:[%s469_s1] sm:$0xff] %vm489_vm1, %v571_v24  ;;  %v1117_v25 = vpop.f32.mrb[1].mxu0  ;;  %v662_v26 = vpop.f32.mrb[0].mxu1 }
 0x1c0   : > { %666 = vst.msk [vmem:[%s476_s3] sm:$0xff] %vm489_vm1, %v662_v26  ;;  %v1128_v27 = vpop.f32.mrb[1].mxu1 }
 0x1c1   : > { %1485 = shalt.err (!%p1482_p3)
}
 0x1c2   : > { %s1486_s18 = scalar_lea.hbm %s2049_s10, 128  ;;  %s1490_s11 = scalar_lea.hbm %s2258_s14, 512 }
 0x1c3   : > { %p1487_p13 = scmp.ne.s32.totalorder %s2049_s10, %s1486_s18  ;;  %p1491_p7 = scmp.lt.u32.totalorder %s2049_s10, %s2258_s14 }
 0x1c4   : > { %p1492_p1 = scmp.lt.u32.totalorder %s1490_s11, %s1486_s18  ;;  %p1494_p6 = scmp.lt.u32.totalorder %s1486_s18, %s2049_s10 }
 0x1c5   : > { %p1488_p10 = pnand %p1487_p13, %p2261_p9 }
 0x1c6   : > { %p1493_p4 = por %p1492_p1, %p1491_p7 }
 0x1c7   : > { %p1489_p11 = pneg %p1488_p10 }
 0x1c8   : > { %p1495_p5 = por %p1494_p6, %p1493_p4 }
 0x1ca   : > { %p1496_p2 = pnand %p1495_p5, %p1489_p11 }
 0x1cc   : > { %1499 = shalt.err (!%p1496_p2)
}
 0x1cd   : > { %1182 = dma.vmem_to_hbm [thread:$0]  (%p2261_p9), %s2051_s23, 128, %s2049_s10, %s759_s24  }
 0x1ce   : > { %s2087_s9 = scalar_lea.sflag [#allocation15], %s406_s8  ;;  %s1500_s25 = scalar_lea.vmem %s2059_s16, 128 }
 0x1cf   : > { %p1501_p12 = scmp.ne.s32.totalorder %s2059_s16, %s1500_s25  ;;  %s1656_s30 = smov [#allocation14]  }
 0x1d0   : > { %s1504_s26 = sshll.u32 %s1656_s30, 4  ;;  %s1505_s26 = int_to_ptr.vmem [resolvable:$false] %s1504_s26 }
 0x1d1   : > { %p1502_p8 = pnand %p1501_p12, %p2261_p9  ;;  %s1506_s15 = scalar_lea.vmem %s1505_s26, 256 }
 0x1d2   : > { %p1507_p3 = scmp.lt.s32.totalorder %s2059_s16, %s1505_s26  ;;  %p1508_p13 = scmp.lt.s32.totalorder %s1506_s15, %s1500_s25 }
 0x1d3   : > { %p1503_p0 = pneg %p1502_p8 }
 0x1d4   : > { %p1509_p10 = por %p1508_p13, %p1507_p3 }
 0x1d6   : > { %p1510_p11 = pnand %p1509_p10, %p1503_p0 }
 0x1d8   : > { %1513 = shalt.err (!%p1510_p11)
}
 0x1d9   : > { %s1514_s13 = scalar_lea.hbm %s2057_s12, 128  ;;  %s1518_s10 = scalar_lea.hbm %s2260_s17, 512 }
 0x1da   : > { %p1515_p7 = scmp.ne.s32.totalorder %s2057_s12, %s1514_s13  ;;  %p1519_p6 = scmp.lt.u32.totalorder %s2057_s12, %s2260_s17 }
 0x1db   : > { %p1520_p5 = scmp.lt.u32.totalorder %s1518_s10, %s1514_s13  ;;  %p1522_p12 = scmp.lt.u32.totalorder %s1514_s13, %s2057_s12 }
 0x1dc   : > { %p1516_p1 = pnand %p1515_p7, %p2261_p9 }
 0x1dd   : > { %p1521_p2 = por %p1520_p5, %p1519_p6 }
 0x1de   : > { %p1517_p4 = pneg %p1516_p1 }
 0x1df   : > { %p1523_p8 = por %p1522_p12, %p1521_p2 }
 0x1e1   : > { %p1524_p0 = pnand %p1523_p8, %p1517_p4 }
 0x1e3   : > { %1527 = shalt.err (!%p1524_p0)
}
 0x1e4   : > { %1183 = dma.vmem_to_hbm [thread:$0]  (%p2261_p9), %s2059_s16, 128, %s2057_s12, %s2087_s9   ;;  %v753_v28 = vpop.f32.mrb[2].mxu0 }
 0x1e5   : > { %s483_s21 = scalar_lea.vmem [#allocation16], %s1984_s6  ;;  %s2262_s11 = sld [smem:[#allocation37_spill]]  ;;  %v1139_v29 = vpop.f32.mrb[3].mxu0 }
 0x1e6   : > { %s814_s18 = sshll.u32 %s483_s21, 4  ;;  %757 = vst.msk [vmem:[%s483_s21] sm:$0xff] %vm489_vm1, %v753_v28  ;;  %s1657_s6 = smov [#allocation16]   ;;  %s2118_s18 = int_to_ptr.vmem [resolvable:$true] %s814_s18 }
 0x1e7   : > { %s1528_s25 = scalar_lea.vmem %s2118_s18, 128  ;;  %s1532_s16 = sshll.u32 %s1657_s6, 4  ;;  %s1533_s16 = int_to_ptr.vmem [resolvable:$false] %s1532_s16 }
 0x1e8   : > { %p1529_p3 = scmp.ne.s32.totalorder %s2118_s18, %s1528_s25  ;;  %s1534_s12 = scalar_lea.vmem %s1533_s16, 256 }
 0x1e9   : > { %p1535_p11 = scmp.lt.s32.totalorder %s2118_s18, %s1533_s16  ;;  %p1536_p7 = scmp.lt.s32.totalorder %s1534_s12, %s1528_s25 }
 0x1ea   : > { %p1530_p13 = pnand %p1529_p3, %p2261_p9 }
 0x1eb   : > { %s2263_s19 = smov %s2262_s11  ;;  %s2116_s27 = scalar_lea.hbm %s2262_s11, %s2041_s7 }
 0x1ec   : > { %p1531_p10 = pneg %p1530_p13  ;;  %p1537_p1 = por %p1536_p7, %p1535_p11 }
 0x1ee   : > { %p1538_p4 = pnand %p1537_p1, %p1531_p10 }
 0x1f0   : > { %1541 = shalt.err (!%p1538_p4)
}
 0x1f1   : > { %s1542_s7 = scalar_lea.hbm %s2116_s27, 128  ;;  %s1546_s15 = scalar_lea.hbm %s2263_s19, 512 }
 0x1f2   : > { %p1543_p6 = scmp.ne.s32.totalorder %s2116_s27, %s1542_s7  ;;  %p1547_p12 = scmp.lt.u32.totalorder %s2116_s27, %s2263_s19 }
 0x1f3   : > { %p1548_p8 = scmp.lt.u32.totalorder %s1546_s15, %s1542_s7  ;;  %p1550_p3 = scmp.lt.u32.totalorder %s1542_s7, %s2116_s27 }
 0x1f4   : > { %p1544_p5 = pnand %p1543_p6, %p2261_p9 }
 0x1f5   : > { %p1549_p0 = por %p1548_p8, %p1547_p12 }
 0x1f6   : > { %p1545_p2 = pneg %p1544_p5 }
 0x1f7   : > { %p1551_p13 = por %p1550_p3, %p1549_p0 }
 0x1f9   : > { %p1552_p10 = pnand %p1551_p13, %p1545_p2 }
 0x1fb   : > { %1555 = shalt.err (!%p1552_p10)
}
 0x1fc   : > { %1184 = dma.vmem_to_hbm [thread:$0]  (%p2261_p9), %s2118_s18, 128, %s2116_s27, %s2087_s9  }
 0x1fd PF: > { %s2264_s23 = sld [smem:[#allocation27_spill]]  ;;  %s2265_s10 = sld [smem:[#allocation23_spill]] }
 0x1fe   : > { %s2266_s24 = sld [smem:[#allocation28_spill]] }
 0x203   : > { %p1225_p11 = scmp.ge.s32.totalorder %s2264_s23, 2  ;;  %s826_s20 = sand.u32 1, %s2265_s10  }
 0x204   : > { %p2267_p7 = scmp.ne.s32.totalorder %s2266_s24, 0  ;;  %s827_s21 = scalar_lea.sflag [#allocation4], %s826_s20 }
 0x206   : > { %p1209_p1 = pnand %p1225_p11, %p2267_p7 }
 0x208   : > { %1605 = dma.done.wait (!%p1209_p1), %s827_s21, 128  }
 0x209   : > { %1607 = vsyncadd (!%p1209_p1), %s827_s21, 4294967168  ;;  %s2268_s1 = sadd.s32 4294967294, %s2264_s23  }
 0x20a   : > { %s835_s3 = sand.u32 1, %s2268_s1  }
 0x20b   : > { %s836_s11 = scalar_lea.sflag [#allocation15], %s835_s3 }
 0x20c   : > { %1609 = dma.done.wait (!%p1209_p1), %s836_s11, 256  }
 0x20d   : > { %1611 = vsyncadd (!%p1209_p1), %s836_s11, 4294967040  ;;  %s33_s12 = sadd.s32 1, %s2264_s23   ;;  %s2269_s22 = sld [smem:[#allocation32_spill]] }
 0x20e   : > { %p30_p9 = scmp.ge.s32.totalorder %s33_s12, 6   ;;  %s2270_s30 = sld [smem:[#allocation25_spill]] }
 0x20f   : > { %s2271_s9 = sld [smem:[#allocation26_spill]]  ;;  %s2272_s10 = sld [smem:[#allocation29_spill]] }
 0x210   : > { %s2273_s11 = sld [smem:[#allocation31_spill]]  ;;  %s2274_s27 = smov %s1618_s28 }
 0x211   : > { %s2275_s28 = smov %s1622_s29  ;;  %32 = sbr.rel (!%p30_p9) target bundleno = 19 (0x13), region = 157 }
 0x213   : > { %s2276_s29 = smov %s2269_s22 }
 0x218   :  { %850 = vsyncpa [#allocation3], 1 }
 0x219   :  { %852 = vsyncpa [#allocation3 + $0x1], 1 }
 0x21a   :  { %853 = vsyncpa [#allocation6], 1 }
 0x21b   :  { %855 = vsyncpa [#allocation6 + $0x1], 1 }
 0x21c   :  { %856 = vsyncpa [#allocation9], 1 }
 0x21d   :  { %857 = vsyncpa [#allocation12], 1 }
 0x21e   :  { %858 = vsyncpa [#allocation4], 1 }
 0x21f   :  { %860 = vsyncpa [#allocation4 + $0x1], 1 }
 0x220   :  { %861 = vsyncpa [#allocation15], 1 }
 0x221   :  { %863 = vsyncpa [#allocation15 + $0x1], 1 }

</bundles_post_ra>
